<compile_context>
chip_gen: v6e
topology: v6e:2x2x1
jax: 0.10.0
libtpu: 0.0.40
codegen_flags: <defaults>
</compile_context>

<pallas_src>
import jax
import jax.numpy as jnp
from jax import lax
from jax.experimental import pallas as pl
from jax.experimental.pallas import tpu as pltpu


_BN_EPS = 1e-5
# Explicit VMEM budget: safe on v5e/v6e (128 MiB) and v7x (64 MiB physical).
_VMEM_LIMIT = 32 * 1024 * 1024


def _round_up(x, m):
    return ((x + m - 1) // m) * m


def _choose_tile(m):
    """Lane-tile size (multiple of 128, <= 512) and padded M."""
    tm = min(512, _round_up(m, 128))
    return tm, _round_up(m, tm)


# ----------------------------------------------------------------------------
# Kernel A: lane-dense matmul + BN batch-statistics accumulation
# ----------------------------------------------------------------------------
def _matmul_stats_kernel(w_ref, p_ref, y_ref, sum_ref, sq_ref):
    # (Cout, K) @ (K, TM) -> (Cout, TM), f32 accumulation on the MXU.
    y = jnp.dot(w_ref[...], p_ref[...], preferred_element_type=jnp.float32)
    y_ref[...] = y

    @pl.when(pl.program_id(0) == 0)
    def _():
        sum_ref[...] = jnp.zeros_like(sum_ref)
        sq_ref[...] = jnp.zeros_like(sq_ref)

    # Full-width lane reductions; accumulators stay resident across M tiles.
    sum_ref[...] += jnp.sum(y, axis=1, keepdims=True)
    sq_ref[...] += jnp.sum(y * y, axis=1, keepdims=True)


def _matmul_stats(w_mat, patches, tm):
    """w_mat: (Cout, K) bf16, patches: (K, Mpad) bf16, Mpad % tm == 0."""
    cout, k = w_mat.shape
    mpad = patches.shape[1]
    nm = mpad // tm
    return pl.pallas_call(
        _matmul_stats_kernel,
        out_shape=(
            jax.ShapeDtypeStruct((cout, mpad), jnp.float32),
            jax.ShapeDtypeStruct((cout, 1), jnp.float32),
            jax.ShapeDtypeStruct((cout, 1), jnp.float32),
        ),
        grid=(nm,),
        in_specs=[
            pl.BlockSpec((cout, k), lambda i: (0, 0)),
            pl.BlockSpec((k, tm), lambda i: (0, i)),
        ],
        out_specs=(
            pl.BlockSpec((cout, tm), lambda i: (0, i)),
            pl.BlockSpec((cout, 1), lambda i: (0, 0)),
            pl.BlockSpec((cout, 1), lambda i: (0, 0)),
        ),
        compiler_params=pltpu.CompilerParams(
            dimension_semantics=("arbitrary",),  # stats accumulated across tiles
            vmem_limit_bytes=_VMEM_LIMIT),
    )(w_mat, patches)


# ----------------------------------------------------------------------------
# Kernel B: folded BatchNorm affine + ReLU (per M tile, fully parallel)
# ----------------------------------------------------------------------------
def _bn_apply_kernel(y_ref, scale_ref, shift_ref, o_ref):
    o_ref[...] = jnp.maximum(y_ref[...] * scale_ref[...] + shift_ref[...], 0.0)


def _bn_relu_apply(y_raw, scale, shift, tm):
    cout, mpad = y_raw.shape
    nm = mpad // tm
    return pl.pallas_call(
        _bn_apply_kernel,
        out_shape=jax.ShapeDtypeStruct((cout, mpad), jnp.float32),
        grid=(nm,),
        in_specs=[
            pl.BlockSpec((cout, tm), lambda i: (0, i)),
            pl.BlockSpec((cout, 1), lambda i: (0, 0)),
            pl.BlockSpec((cout, 1), lambda i: (0, 0)),
        ],
        out_specs=pl.BlockSpec((cout, tm), lambda i: (0, i)),
        compiler_params=pltpu.CompilerParams(
            dimension_semantics=("parallel",),   # both TCs on v7x
            vmem_limit_bytes=_VMEM_LIMIT),
    )(y_raw, scale, shift)


# ----------------------------------------------------------------------------
# Final-layer kernel: matmul + tanh
# ----------------------------------------------------------------------------
def _matmul_tanh_kernel(w_ref, p_ref, o_ref):
    y = jnp.dot(w_ref[...], p_ref[...], preferred_element_type=jnp.float32)
    o_ref[...] = jnp.tanh(y)


# ----------------------------------------------------------------------------
# JAX glue (runs under jit): transposed-conv -> dilate + pad + im2col (K, M)
# ----------------------------------------------------------------------------
def _dilate_and_pad(x, stride, padding, ksize):
    """Zero-insert (stride-1) between pixels, then pad by (ksize-1-padding)."""
    n, c, h, w = x.shape
    if stride > 1:
        hd = (h - 1) * stride + 1
        wd = (w - 1) * stride + 1
        xd = jnp.zeros((n, c, hd, wd), x.dtype).at[:, :, ::stride, ::stride].set(x)
    else:
        xd = x
    pad = ksize - 1 - padding
    return jnp.pad(xd, ((0, 0), (0, 0), (pad, pad), (pad, pad)))


def _im2col_T(x_pad, ksize, hout, wout):
    """-> (Cin*ksize*ksize, N*hout*wout); K index = ci*KK + kh*K + kw,
    M index = n*hout*wout + oh*wout + ow (lane-dense M)."""
    n, c = x_pad.shape[:2]
    cols = []
    for kh in range(ksize):
        for kw in range(ksize):
            cols.append(x_pad[:, :, kh:kh + hout, kw:kw + wout])
    pat = jnp.stack(cols, axis=2)          # (N, Cin, K*K, hout, wout)
    pat = pat.transpose(1, 2, 0, 3, 4)     # (Cin, K*K, N, hout, wout)
    return pat.reshape(c * ksize * ksize, n * hout * wout)


def _convT_weight_to_matmul(w):
    """PyTorch ConvTranspose2d weight (Cin, Cout, K, K) -> (Cout, Cin*K*K)
    bf16 matmul weight for the equivalent flipped-kernel cross-correlation."""
    cin, cout, K, _ = w.shape
    w_flip = w[:, :, ::-1, ::-1]                    # spatial flip
    w_conv = jnp.transpose(w_flip, (1, 0, 2, 3))    # (Cout, Cin, K, K)
    return w_conv.reshape(cout, cin * K * K).astype(jnp.bfloat16)


def _fused_convT_bn_relu(x, w_mat, gamma, beta, stride, padding, ksize):
    """ConvTranspose2d + BatchNorm2d(train) + ReLU, NCHW in/out."""
    n, _, h, w = x.shape
    cout = w_mat.shape[0]
    hout = (h - 1) * stride - 2 * padding + ksize
    wout = (w - 1) * stride - 2 * padding + ksize
    m = n * hout * wout
    tm, mpad = _choose_tile(m)

    xp = _dilate_and_pad(x, stride, padding, ksize)
    patches = _im2col_T(xp, ksize, hout, wout)                   # (K, M) f32
    patches = jnp.pad(patches, ((0, 0), (0, mpad - m))).astype(jnp.bfloat16)

    y_raw, psum, psq = _matmul_stats(w_mat, patches, tm)

    # Zero-padded columns contribute 0 to sum/sumsq -> divide by the TRUE M.
    inv_m = 1.0 / float(m)
    mean = psum * inv_m                                          # (Cout, 1)
    var = jnp.maximum(psq * inv_m - mean * mean, 0.0)            # biased var
    scale = gamma.reshape(cout, 1) * lax.rsqrt(var + _BN_EPS)
    shift = beta.reshape(cout, 1) - mean * scale

    y = _bn_relu_apply(y_raw, scale, shift, tm)                  # (Cout, Mpad)
    return y[:, :m].reshape(cout, n, hout, wout).transpose(1, 0, 2, 3)


def _fused_convT_tanh(x, w_mat, stride, padding, ksize):
    """Final ConvTranspose2d + Tanh, NCHW in/out."""
    n, _, h, w = x.shape
    cout, k = w_mat.shape
    hout = (h - 1) * stride - 2 * padding + ksize
    wout = (w - 1) * stride - 2 * padding + ksize
    m = n * hout * wout
    tm, mpad = _choose_tile(m)

    xp = _dilate_and_pad(x, stride, padding, ksize)
    patches = _im2col_T(xp, ksize, hout, wout)
    patches = jnp.pad(patches, ((0, 0), (0, mpad - m))).astype(jnp.bfloat16)
    nm = mpad // tm

    y = pl.pallas_call(
        _matmul_tanh_kernel,
        out_shape=jax.ShapeDtypeStruct((cout, mpad), jnp.float32),
        grid=(nm,),
        in_specs=[
            pl.BlockSpec((cout, k), lambda i: (0, 0)),
            pl.BlockSpec((k, tm), lambda i: (0, i)),
        ],
        out_specs=pl.BlockSpec((cout, tm), lambda i: (0, i)),
        compiler_params=pltpu.CompilerParams(
            dimension_semantics=("parallel",),
            vmem_limit_bytes=_VMEM_LIMIT),
    )(w_mat, patches)
    return y[:, :m].reshape(cout, n, hout, wout).transpose(1, 0, 2, 3)


def _generator_forward(params, x):
    h = _fused_convT_bn_relu(x, params["w1"], params["g1"], params["b1"], 1, 0, 7)  # (N, ngf*4, 7, 7)
    h = _fused_convT_bn_relu(h, params["w2"], params["g2"], params["b2"], 2, 1, 4)  # (N, ngf*2, 14, 14)
    h = _fused_convT_bn_relu(h, params["w3"], params["g3"], params["b3"], 2, 1, 4)  # (N, ngf, 28, 28)
    return _fused_convT_tanh(h, params["w4"], 2, 1, 4)                              # (N, nc, 56, 56)


# ----------------------------------------------------------------------------
# Generator (parameters initialized deterministically in-script)
# ----------------------------------------------------------------------------
class GeneratorPallas:
    def __init__(self, nz, nc, ngf, ngpu, key):
        self.nz, self.nc, self.ngf, self.ngpu = nz, nc, ngf, ngpu
        k1, k2, k3, k4 = jax.random.split(key, 4)

        def conv_w(k, cin, cout, ks):
            # DCGAN-style N(0, 0.02) init, deterministic via PRNGKey.
            return 0.02 * jax.random.normal(k, (cin, cout, ks, ks), jnp.float32)

        # Weight re-layout hoisted here (done once, not per forward call).
        self.params = {
            "w1": _convT_weight_to_matmul(conv_w(k1, nz, ngf * 4, 7)),
            "w2": _convT_weight_to_matmul(conv_w(k2, ngf * 4, ngf * 2, 4)),
            "w3": _convT_weight_to_matmul(conv_w(k3, ngf * 2, ngf, 4)),
            "w4": _convT_weight_to_matmul(conv_w(k4, ngf, nc, 4)),
            # BatchNorm2d affine params (PyTorch default init: weight=1, bias=0).
            "g1": jnp.ones((ngf * 4,), jnp.float32),
            "b1": jnp.zeros((ngf * 4,), jnp.float32),
            "g2": jnp.ones((ngf * 2,), jnp.float32),
            "b2": jnp.zeros((ngf * 2,), jnp.float32),
            "g3": jnp.ones((ngf,), jnp.float32),
            "b3": jnp.zeros((ngf,), jnp.float32),
        }
        self._fwd = jax.jit(_generator_forward)

    def __call__(self, x):
        return self._fwd(self.params, x)


if __name__ == "__main__":
    # Small, forward-consistent shapes: z latent is (N, nz, 1, 1).
    nz, nc, ngf, ngpu = 8, 1, 8, 1
    batch = 2

    key = jax.random.PRNGKey(0)
    k_params, k_input = jax.random.split(key)

    gen = GeneratorPallas(nz, nc, ngf, ngpu, k_params)
    z = jax.random.normal(k_input, (batch, nz, 1, 1), jnp.float32)

    out = jax.block_until_ready(gen(z))

    assert out.shape == (batch, nc, 56, 56), out.shape
    assert bool(jnp.all(jnp.isfinite(out)))
    assert bool(jnp.all(jnp.abs(out) <= 1.0 + 1e-5))  # tanh range
    print("KERNEL_OK")
</pallas_src>

<mosaic_0001>
module attributes {stable_mosaic.version = 11 : i64} {
  func.func @_matmul_stats_kernel(%arg0: i32, %arg1: memref<32x392xbf16, #tpu.memory_space<vmem>>, %arg2: memref<392x128xbf16, #tpu.memory_space<vmem>>, %arg3: memref<32x128xf32, #tpu.memory_space<vmem>>, %arg4: memref<32x1xf32, #tpu.memory_space<vmem>>, %arg5: memref<32x1xf32, #tpu.memory_space<vmem>>) attributes {dimension_semantics = [#tpu.dimension_semantics<arbitrary>], iteration_bounds = array<i64: 1>, scalar_prefetch = 0 : i64, scratch_operands = 0 : i64, tpu.core_type = #tpu.core_type<tc>, window_params = [{pipeline_mode = #tpu.pipeline_mode<synchronous>, transform_indices = @transform_0, window_bounds = array<i64: 32, 392>}, {transform_indices = @transform_1, window_bounds = array<i64: 392, 128>}, {transform_indices = @transform_2, window_bounds = array<i64: 32, 128>}, {pipeline_mode = #tpu.pipeline_mode<synchronous>, transform_indices = @transform_3, window_bounds = array<i64: 32, 1>}, {pipeline_mode = #tpu.pipeline_mode<synchronous>, transform_indices = @transform_4, window_bounds = array<i64: 32, 1>}]} {
    %c0 = arith.constant 0 : index
    %c0_0 = arith.constant 0 : index
    %0 = vector.load %arg1[%c0, %c0_0] : memref<32x392xbf16, #tpu.memory_space<vmem>>, vector<32x392xbf16>
    %c0_1 = arith.constant 0 : index
    %c0_2 = arith.constant 0 : index
    %1 = vector.load %arg2[%c0_1, %c0_2] : memref<392x128xbf16, #tpu.memory_space<vmem>>, vector<392x128xbf16>
    %cst = arith.constant dense<0.000000e+00> : vector<32x128xf32>
    %2 = tpu.matmul %0, %1, %cst {dimension_numbers = #tpu.dot_dimension_numbers<[1], [0], [0], [1], [0, 0, 1, 1], [], []>} : vector<32x392xbf16>, vector<392x128xbf16>, vector<32x128xf32> -> vector<32x128xf32>
    %c0_3 = arith.constant 0 : index
    %c0_4 = arith.constant 0 : index
    %3 = vector.load %arg3[%c0_3, %c0_4] : memref<32x128xf32, #tpu.memory_space<vmem>>, vector<32x128xf32>
    tpu.vector_store %arg3[%c0_3, %c0_4], %2 {strides = array<i32>} : memref<32x128xf32, #tpu.memory_space<vmem>>, vector<32x128xf32>,
    %c0_i32 = arith.constant 0 : i32
    %4 = arith.cmpi eq, %arg0, %c0_i32 : i32
    %5 = arith.extui %4 : i1 to i32
    %c0_i32_5 = arith.constant 0 : i32
    %6 = arith.cmpi ne, %5, %c0_i32_5 : i32
    scf.if %6 {
      %cst_16 = arith.constant 0.000000e+00 : f32
      %18 = vector.broadcast %cst_16 : f32 to vector<32x1xf32>
      %c0_17 = arith.constant 0 : index
      %c0_18 = arith.constant 0 : index
      %19 = vector.load %arg4[%c0_17, %c0_18] : memref<32x1xf32, #tpu.memory_space<vmem>>, vector<32x1xf32>
      tpu.vector_store %arg4[%c0_17, %c0_18], %18 {strides = array<i32>} : memref<32x1xf32, #tpu.memory_space<vmem>>, vector<32x1xf32>,
      %cst_19 = arith.constant 0.000000e+00 : f32
      %20 = vector.broadcast %cst_19 : f32 to vector<32x1xf32>
      %c0_20 = arith.constant 0 : index
      %c0_21 = arith.constant 0 : index
      %21 = vector.load %arg5[%c0_20, %c0_21] : memref<32x1xf32, #tpu.memory_space<vmem>>, vector<32x1xf32>
      tpu.vector_store %arg5[%c0_20, %c0_21], %20 {strides = array<i32>} : memref<32x1xf32, #tpu.memory_space<vmem>>, vector<32x1xf32>,
    } else {
    }
    %c0_6 = arith.constant 0 : index
    %c0_7 = arith.constant 0 : index
    %7 = vector.load %arg4[%c0_6, %c0_7] : memref<32x1xf32, #tpu.memory_space<vmem>>, vector<32x1xf32>
    %cst_8 = arith.constant dense<0.000000e+00> : vector<32xf32>
    %8 = vector.multi_reduction <add>, %2, %cst_8 [1] : vector<32x128xf32> to vector<32xf32>
    %9 = vector.shape_cast %8 : vector<32xf32> to vector<32x1xf32>
    %10 = arith.addf %7, %9 : vector<32x1xf32>
    %c0_9 = arith.constant 0 : index
    %c0_10 = arith.constant 0 : index
    %11 = vector.load %arg4[%c0_9, %c0_10] : memref<32x1xf32, #tpu.memory_space<vmem>>, vector<32x1xf32>
    tpu.vector_store %arg4[%c0_9, %c0_10], %10 {strides = array<i32>} : memref<32x1xf32, #tpu.memory_space<vmem>>, vector<32x1xf32>,
    %c0_11 = arith.constant 0 : index
    %c0_12 = arith.constant 0 : index
    %12 = vector.load %arg5[%c0_11, %c0_12] : memref<32x1xf32, #tpu.memory_space<vmem>>, vector<32x1xf32>
    %13 = arith.mulf %2, %2 : vector<32x128xf32>
    %cst_13 = arith.constant dense<0.000000e+00> : vector<32xf32>
    %14 = vector.multi_reduction <add>, %13, %cst_13 [1] : vector<32x128xf32> to vector<32xf32>
    %15 = vector.shape_cast %14 : vector<32xf32> to vector<32x1xf32>
    %16 = arith.addf %12, %15 : vector<32x1xf32>
    %c0_14 = arith.constant 0 : index
    %c0_15 = arith.constant 0 : index
    %17 = vector.load %arg5[%c0_14, %c0_15] : memref<32x1xf32, #tpu.memory_space<vmem>>, vector<32x1xf32>
    tpu.vector_store %arg5[%c0_14, %c0_15], %16 {strides = array<i32>} : memref<32x1xf32, #tpu.memory_space<vmem>>, vector<32x1xf32>,
    return
  }
  func.func @transform_0(%arg0: i32) -> (i32, i32) {
    %c0_i32 = arith.constant 0 : i32
    %c0_i32_0 = arith.constant 0 : i32
    %c0_i32_1 = arith.constant 0 : i32
    return %c0_i32, %c0_i32_0 : i32, i32
  }
  func.func @transform_1(%arg0: i32) -> (i32, i32) {
    %c0_i32 = arith.constant 0 : i32
    %c0_i32_0 = arith.constant 0 : i32
    return %c0_i32, %arg0 : i32, i32
  }
  func.func @transform_2(%arg0: i32) -> (i32, i32) {
    %c0_i32 = arith.constant 0 : i32
    %c0_i32_0 = arith.constant 0 : i32
    return %c0_i32, %arg0 : i32, i32
  }
  func.func @transform_3(%arg0: i32) -> (i32, i32) {
    %c0_i32 = arith.constant 0 : i32
    %c0_i32_0 = arith.constant 0 : i32
    %c0_i32_1 = arith.constant 0 : i32
    return %c0_i32, %c0_i32_0 : i32, i32
  }
  func.func @transform_4(%arg0: i32) -> (i32, i32) {
    %c0_i32 = arith.constant 0 : i32
    %c0_i32_0 = arith.constant 0 : i32
    %c0_i32_1 = arith.constant 0 : i32
    return %c0_i32, %c0_i32_0 : i32, i32
  }
}

module attributes {stable_mosaic.version = 11 : i64} {
  func.func @_bn_apply_kernel(%arg0: i32, %arg1: memref<32x128xf32, #tpu.memory_space<vmem>>, %arg2: memref<32x1xf32, #tpu.memory_space<vmem>>, %arg3: memref<32x1xf32, #tpu.memory_space<vmem>>, %arg4: memref<32x128xf32, #tpu.memory_space<vmem>>) attributes {dimension_semantics = [#tpu.dimension_semantics<parallel>], iteration_bounds = array<i64: 1>, scalar_prefetch = 0 : i64, scratch_operands = 0 : i64, tpu.core_type = #tpu.core_type<tc>, window_params = [{transform_indices = @transform_0, window_bounds = array<i64: 32, 128>}, {pipeline_mode = #tpu.pipeline_mode<synchronous>, transform_indices = @transform_1, window_bounds = array<i64: 32, 1>}, {pipeline_mode = #tpu.pipeline_mode<synchronous>, transform_indices = @transform_2, window_bounds = array<i64: 32, 1>}, {transform_indices = @transform_3, window_bounds = array<i64: 32, 128>}]} {
    %c0 = arith.constant 0 : index
    %c0_0 = arith.constant 0 : index
    %0 = vector.load %arg1[%c0, %c0_0] : memref<32x128xf32, #tpu.memory_space<vmem>>, vector<32x128xf32>
    %c0_1 = arith.constant 0 : index
    %c0_2 = arith.constant 0 : index
    %1 = vector.load %arg2[%c0_1, %c0_2] : memref<32x1xf32, #tpu.memory_space<vmem>>, vector<32x1xf32>
    %2 = vector.broadcast %1 : vector<32x1xf32> to vector<32x128xf32>
    %3 = arith.mulf %0, %2 : vector<32x128xf32>
    %c0_3 = arith.constant 0 : index
    %c0_4 = arith.constant 0 : index
    %4 = vector.load %arg3[%c0_3, %c0_4] : memref<32x1xf32, #tpu.memory_space<vmem>>, vector<32x1xf32>
    %5 = vector.broadcast %4 : vector<32x1xf32> to vector<32x128xf32>
    %6 = arith.addf %3, %5 : vector<32x128xf32>
    %cst = arith.constant 0.000000e+00 : f32
    %7 = vector.broadcast %cst : f32 to vector<32x128xf32>
    %8 = arith.maximumf %6, %7 : vector<32x128xf32>
    %c0_5 = arith.constant 0 : index
    %c0_6 = arith.constant 0 : index
    %9 = vector.load %arg4[%c0_5, %c0_6] : memref<32x128xf32, #tpu.memory_space<vmem>>, vector<32x128xf32>
    tpu.vector_store %arg4[%c0_5, %c0_6], %8 {strides = array<i32>} : memref<32x128xf32, #tpu.memory_space<vmem>>, vector<32x128xf32>,
    return
  }
  func.func @transform_0(%arg0: i32) -> (i32, i32) {
    %c0_i32 = arith.constant 0 : i32
    %c0_i32_0 = arith.constant 0 : i32
    return %c0_i32, %arg0 : i32, i32
  }
  func.func @transform_1(%arg0: i32) -> (i32, i32) {
    %c0_i32 = arith.constant 0 : i32
    %c0_i32_0 = arith.constant 0 : i32
    %c0_i32_1 = arith.constant 0 : i32
    return %c0_i32, %c0_i32_0 : i32, i32
  }
  func.func @transform_2(%arg0: i32) -> (i32, i32) {
    %c0_i32 = arith.constant 0 : i32
    %c0_i32_0 = arith.constant 0 : i32
    %c0_i32_1 = arith.constant 0 : i32
    return %c0_i32, %c0_i32_0 : i32, i32
  }
  func.func @transform_3(%arg0: i32) -> (i32, i32) {
    %c0_i32 = arith.constant 0 : i32
    %c0_i32_0 = arith.constant 0 : i32
    return %c0_i32, %arg0 : i32, i32
  }
}

module attributes {stable_mosaic.version = 11 : i64} {
  func.func @_matmul_stats_kernel(%arg0: i32, %arg1: memref<16x512xbf16, #tpu.memory_space<vmem>>, %arg2: memref<512x512xbf16, #tpu.memory_space<vmem>>, %arg3: memref<16x512xf32, #tpu.memory_space<vmem>>, %arg4: memref<16x1xf32, #tpu.memory_space<vmem>>, %arg5: memref<16x1xf32, #tpu.memory_space<vmem>>) attributes {dimension_semantics = [#tpu.dimension_semantics<arbitrary>], iteration_bounds = array<i64: 1>, scalar_prefetch = 0 : i64, scratch_operands = 0 : i64, tpu.core_type = #tpu.core_type<tc>, window_params = [{pipeline_mode = #tpu.pipeline_mode<synchronous>, transform_indices = @transform_0, window_bounds = array<i64: 16, 512>}, {transform_indices = @transform_1, window_bounds = array<i64: 512, 512>}, {transform_indices = @transform_2, window_bounds = array<i64: 16, 512>}, {pipeline_mode = #tpu.pipeline_mode<synchronous>, transform_indices = @transform_3, window_bounds = array<i64: 16, 1>}, {pipeline_mode = #tpu.pipeline_mode<synchronous>, transform_indices = @transform_4, window_bounds = array<i64: 16, 1>}]} {
    %c0 = arith.constant 0 : index
    %c0_0 = arith.constant 0 : index
    %0 = vector.load %arg1[%c0, %c0_0] : memref<16x512xbf16, #tpu.memory_space<vmem>>, vector<16x512xbf16>
    %c0_1 = arith.constant 0 : index
    %c0_2 = arith.constant 0 : index
    %1 = vector.load %arg2[%c0_1, %c0_2] : memref<512x512xbf16, #tpu.memory_space<vmem>>, vector<512x512xbf16>
    %cst = arith.constant dense<0.000000e+00> : vector<16x512xf32>
    %2 = tpu.matmul %0, %1, %cst {dimension_numbers = #tpu.dot_dimension_numbers<[1], [0], [0], [1], [0, 0, 1, 1], [], []>} : vector<16x512xbf16>, vector<512x512xbf16>, vector<16x512xf32> -> vector<16x512xf32>
    %c0_3 = arith.constant 0 : index
    %c0_4 = arith.constant 0 : index
    %3 = vector.load %arg3[%c0_3, %c0_4] : memref<16x512xf32, #tpu.memory_space<vmem>>, vector<16x512xf32>
    tpu.vector_store %arg3[%c0_3, %c0_4], %2 {strides = array<i32>} : memref<16x512xf32, #tpu.memory_space<vmem>>, vector<16x512xf32>,
    %c0_i32 = arith.constant 0 : i32
    %4 = arith.cmpi eq, %arg0, %c0_i32 : i32
    %5 = arith.extui %4 : i1 to i32
    %c0_i32_5 = arith.constant 0 : i32
    %6 = arith.cmpi ne, %5, %c0_i32_5 : i32
    scf.if %6 {
      %cst_16 = arith.constant 0.000000e+00 : f32
      %18 = vector.broadcast %cst_16 : f32 to vector<16x1xf32>
      %c0_17 = arith.constant 0 : index
      %c0_18 = arith.constant 0 : index
      %19 = vector.load %arg4[%c0_17, %c0_18] : memref<16x1xf32, #tpu.memory_space<vmem>>, vector<16x1xf32>
      tpu.vector_store %arg4[%c0_17, %c0_18], %18 {strides = array<i32>} : memref<16x1xf32, #tpu.memory_space<vmem>>, vector<16x1xf32>,
      %cst_19 = arith.constant 0.000000e+00 : f32
      %20 = vector.broadcast %cst_19 : f32 to vector<16x1xf32>
      %c0_20 = arith.constant 0 : index
      %c0_21 = arith.constant 0 : index
      %21 = vector.load %arg5[%c0_20, %c0_21] : memref<16x1xf32, #tpu.memory_space<vmem>>, vector<16x1xf32>
      tpu.vector_store %arg5[%c0_20, %c0_21], %20 {strides = array<i32>} : memref<16x1xf32, #tpu.memory_space<vmem>>, vector<16x1xf32>,
    } else {
    }
    %c0_6 = arith.constant 0 : index
    %c0_7 = arith.constant 0 : index
    %7 = vector.load %arg4[%c0_6, %c0_7] : memref<16x1xf32, #tpu.memory_space<vmem>>, vector<16x1xf32>
    %cst_8 = arith.constant dense<0.000000e+00> : vector<16xf32>
    %8 = vector.multi_reduction <add>, %2, %cst_8 [1] : vector<16x512xf32> to vector<16xf32>
    %9 = vector.shape_cast %8 : vector<16xf32> to vector<16x1xf32>
    %10 = arith.addf %7, %9 : vector<16x1xf32>
    %c0_9 = arith.constant 0 : index
    %c0_10 = arith.constant 0 : index
    %11 = vector.load %arg4[%c0_9, %c0_10] : memref<16x1xf32, #tpu.memory_space<vmem>>, vector<16x1xf32>
    tpu.vector_store %arg4[%c0_9, %c0_10], %10 {strides = array<i32>} : memref<16x1xf32, #tpu.memory_space<vmem>>, vector<16x1xf32>,
    %c0_11 = arith.constant 0 : index
    %c0_12 = arith.constant 0 : index
    %12 = vector.load %arg5[%c0_11, %c0_12] : memref<16x1xf32, #tpu.memory_space<vmem>>, vector<16x1xf32>
    %13 = arith.mulf %2, %2 : vector<16x512xf32>
    %cst_13 = arith.constant dense<0.000000e+00> : vector<16xf32>
    %14 = vector.multi_reduction <add>, %13, %cst_13 [1] : vector<16x512xf32> to vector<16xf32>
    %15 = vector.shape_cast %14 : vector<16xf32> to vector<16x1xf32>
    %16 = arith.addf %12, %15 : vector<16x1xf32>
    %c0_14 = arith.constant 0 : index
    %c0_15 = arith.constant 0 : index
    %17 = vector.load %arg5[%c0_14, %c0_15] : memref<16x1xf32, #tpu.memory_space<vmem>>, vector<16x1xf32>
    tpu.vector_store %arg5[%c0_14, %c0_15], %16 {strides = array<i32>} : memref<16x1xf32, #tpu.memory_space<vmem>>, vector<16x1xf32>,
    return
  }
  func.func @transform_0(%arg0: i32) -> (i32, i32) {
    %c0_i32 = arith.constant 0 : i32
    %c0_i32_0 = arith.constant 0 : i32
    %c0_i32_1 = arith.constant 0 : i32
    return %c0_i32, %c0_i32_0 : i32, i32
  }
  func.func @transform_1(%arg0: i32) -> (i32, i32) {
    %c0_i32 = arith.constant 0 : i32
    %c0_i32_0 = arith.constant 0 : i32
    return %c0_i32, %arg0 : i32, i32
  }
  func.func @transform_2(%arg0: i32) -> (i32, i32) {
    %c0_i32 = arith.constant 0 : i32
    %c0_i32_0 = arith.constant 0 : i32
    return %c0_i32, %arg0 : i32, i32
  }
  func.func @transform_3(%arg0: i32) -> (i32, i32) {
    %c0_i32 = arith.constant 0 : i32
    %c0_i32_0 = arith.constant 0 : i32
    %c0_i32_1 = arith.constant 0 : i32
    return %c0_i32, %c0_i32_0 : i32, i32
  }
  func.func @transform_4(%arg0: i32) -> (i32, i32) {
    %c0_i32 = arith.constant 0 : i32
    %c0_i32_0 = arith.constant 0 : i32
    %c0_i32_1 = arith.constant 0 : i32
    return %c0_i32, %c0_i32_0 : i32, i32
  }
}

module attributes {stable_mosaic.version = 11 : i64} {
  func.func @_bn_apply_kernel(%arg0: i32, %arg1: memref<16x512xf32, #tpu.memory_space<vmem>>, %arg2: memref<16x1xf32, #tpu.memory_space<vmem>>, %arg3: memref<16x1xf32, #tpu.memory_space<vmem>>, %arg4: memref<16x512xf32, #tpu.memory_space<vmem>>) attributes {dimension_semantics = [#tpu.dimension_semantics<parallel>], iteration_bounds = array<i64: 1>, scalar_prefetch = 0 : i64, scratch_operands = 0 : i64, tpu.core_type = #tpu.core_type<tc>, window_params = [{transform_indices = @transform_0, window_bounds = array<i64: 16, 512>}, {pipeline_mode = #tpu.pipeline_mode<synchronous>, transform_indices = @transform_1, window_bounds = array<i64: 16, 1>}, {pipeline_mode = #tpu.pipeline_mode<synchronous>, transform_indices = @transform_2, window_bounds = array<i64: 16, 1>}, {transform_indices = @transform_3, window_bounds = array<i64: 16, 512>}]} {
    %c0 = arith.constant 0 : index
    %c0_0 = arith.constant 0 : index
    %0 = vector.load %arg1[%c0, %c0_0] : memref<16x512xf32, #tpu.memory_space<vmem>>, vector<16x512xf32>
    %c0_1 = arith.constant 0 : index
    %c0_2 = arith.constant 0 : index
    %1 = vector.load %arg2[%c0_1, %c0_2] : memref<16x1xf32, #tpu.memory_space<vmem>>, vector<16x1xf32>
    %2 = vector.broadcast %1 : vector<16x1xf32> to vector<16x512xf32>
    %3 = arith.mulf %0, %2 : vector<16x512xf32>
    %c0_3 = arith.constant 0 : index
    %c0_4 = arith.constant 0 : index
    %4 = vector.load %arg3[%c0_3, %c0_4] : memref<16x1xf32, #tpu.memory_space<vmem>>, vector<16x1xf32>
    %5 = vector.broadcast %4 : vector<16x1xf32> to vector<16x512xf32>
    %6 = arith.addf %3, %5 : vector<16x512xf32>
    %cst = arith.constant 0.000000e+00 : f32
    %7 = vector.broadcast %cst : f32 to vector<16x512xf32>
    %8 = arith.maximumf %6, %7 : vector<16x512xf32>
    %c0_5 = arith.constant 0 : index
    %c0_6 = arith.constant 0 : index
    %9 = vector.load %arg4[%c0_5, %c0_6] : memref<16x512xf32, #tpu.memory_space<vmem>>, vector<16x512xf32>
    tpu.vector_store %arg4[%c0_5, %c0_6], %8 {strides = array<i32>} : memref<16x512xf32, #tpu.memory_space<vmem>>, vector<16x512xf32>,
    return
  }
  func.func @transform_0(%arg0: i32) -> (i32, i32) {
    %c0_i32 = arith.constant 0 : i32
    %c0_i32_0 = arith.constant 0 : i32
    return %c0_i32, %arg0 : i32, i32
  }
  func.func @transform_1(%arg0: i32) -> (i32, i32) {
    %c0_i32 = arith.constant 0 : i32
    %c0_i32_0 = arith.constant 0 : i32
    %c0_i32_1 = arith.constant 0 : i32
    return %c0_i32, %c0_i32_0 : i32, i32
  }
  func.func @transform_2(%arg0: i32) -> (i32, i32) {
    %c0_i32 = arith.constant 0 : i32
    %c0_i32_0 = arith.constant 0 : i32
    %c0_i32_1 = arith.constant 0 : i32
    return %c0_i32, %c0_i32_0 : i32, i32
  }
  func.func @transform_3(%arg0: i32) -> (i32, i32) {
    %c0_i32 = arith.constant 0 : i32
    %c0_i32_0 = arith.constant 0 : i32
    return %c0_i32, %arg0 : i32, i32
  }
}

module attributes {stable_mosaic.version = 11 : i64} {
  func.func @_matmul_stats_kernel(%arg0: i32, %arg1: memref<8x256xbf16, #tpu.memory_space<vmem>>, %arg2: memref<256x512xbf16, #tpu.memory_space<vmem>>, %arg3: memref<8x512xf32, #tpu.memory_space<vmem>>, %arg4: memref<8x1xf32, #tpu.memory_space<vmem>>, %arg5: memref<8x1xf32, #tpu.memory_space<vmem>>) attributes {dimension_semantics = [#tpu.dimension_semantics<arbitrary>], iteration_bounds = array<i64: 4>, scalar_prefetch = 0 : i64, scratch_operands = 0 : i64, tpu.core_type = #tpu.core_type<tc>, window_params = [{pipeline_mode = #tpu.pipeline_mode<synchronous>, transform_indices = @transform_0, window_bounds = array<i64: 8, 256>}, {transform_indices = @transform_1, window_bounds = array<i64: 256, 512>}, {transform_indices = @transform_2, window_bounds = array<i64: 8, 512>}, {pipeline_mode = #tpu.pipeline_mode<synchronous>, transform_indices = @transform_3, window_bounds = array<i64: 8, 1>}, {pipeline_mode = #tpu.pipeline_mode<synchronous>, transform_indices = @transform_4, window_bounds = array<i64: 8, 1>}]} {
    %c0 = arith.constant 0 : index
    %c0_0 = arith.constant 0 : index
    %0 = vector.load %arg1[%c0, %c0_0] : memref<8x256xbf16, #tpu.memory_space<vmem>>, vector<8x256xbf16>
    %c0_1 = arith.constant 0 : index
    %c0_2 = arith.constant 0 : index
    %1 = vector.load %arg2[%c0_1, %c0_2] : memref<256x512xbf16, #tpu.memory_space<vmem>>, vector<256x512xbf16>
    %cst = arith.constant dense<0.000000e+00> : vector<8x512xf32>
    %2 = tpu.matmul %0, %1, %cst {dimension_numbers = #tpu.dot_dimension_numbers<[1], [0], [0], [1], [0, 0, 1, 1], [], []>} : vector<8x256xbf16>, vector<256x512xbf16>, vector<8x512xf32> -> vector<8x512xf32>
    %c0_3 = arith.constant 0 : index
    %c0_4 = arith.constant 0 : index
    %3 = vector.load %arg3[%c0_3, %c0_4] : memref<8x512xf32, #tpu.memory_space<vmem>>, vector<8x512xf32>
    tpu.vector_store %arg3[%c0_3, %c0_4], %2 {strides = array<i32>} : memref<8x512xf32, #tpu.memory_space<vmem>>, vector<8x512xf32>,
    %c0_i32 = arith.constant 0 : i32
    %4 = arith.cmpi eq, %arg0, %c0_i32 : i32
    %5 = arith.extui %4 : i1 to i32
    %c0_i32_5 = arith.constant 0 : i32
    %6 = arith.cmpi ne, %5, %c0_i32_5 : i32
    scf.if %6 {
      %cst_16 = arith.constant 0.000000e+00 : f32
      %18 = vector.broadcast %cst_16 : f32 to vector<8x1xf32>
      %c0_17 = arith.constant 0 : index
      %c0_18 = arith.constant 0 : index
      %19 = vector.load %arg4[%c0_17, %c0_18] : memref<8x1xf32, #tpu.memory_space<vmem>>, vector<8x1xf32>
      tpu.vector_store %arg4[%c0_17, %c0_18], %18 {strides = array<i32>} : memref<8x1xf32, #tpu.memory_space<vmem>>, vector<8x1xf32>,
      %cst_19 = arith.constant 0.000000e+00 : f32
      %20 = vector.broadcast %cst_19 : f32 to vector<8x1xf32>
      %c0_20 = arith.constant 0 : index
      %c0_21 = arith.constant 0 : index
      %21 = vector.load %arg5[%c0_20, %c0_21] : memref<8x1xf32, #tpu.memory_space<vmem>>, vector<8x1xf32>
      tpu.vector_store %arg5[%c0_20, %c0_21], %20 {strides = array<i32>} : memref<8x1xf32, #tpu.memory_space<vmem>>, vector<8x1xf32>,
    } else {
    }
    %c0_6 = arith.constant 0 : index
    %c0_7 = arith.constant 0 : index
    %7 = vector.load %arg4[%c0_6, %c0_7] : memref<8x1xf32, #tpu.memory_space<vmem>>, vector<8x1xf32>
    %cst_8 = arith.constant dense<0.000000e+00> : vector<8xf32>
    %8 = vector.multi_reduction <add>, %2, %cst_8 [1] : vector<8x512xf32> to vector<8xf32>
    %9 = vector.shape_cast %8 : vector<8xf32> to vector<8x1xf32>
    %10 = arith.addf %7, %9 : vector<8x1xf32>
    %c0_9 = arith.constant 0 : index
    %c0_10 = arith.constant 0 : index
    %11 = vector.load %arg4[%c0_9, %c0_10] : memref<8x1xf32, #tpu.memory_space<vmem>>, vector<8x1xf32>
    tpu.vector_store %arg4[%c0_9, %c0_10], %10 {strides = array<i32>} : memref<8x1xf32, #tpu.memory_space<vmem>>, vector<8x1xf32>,
    %c0_11 = arith.constant 0 : index
    %c0_12 = arith.constant 0 : index
    %12 = vector.load %arg5[%c0_11, %c0_12] : memref<8x1xf32, #tpu.memory_space<vmem>>, vector<8x1xf32>
    %13 = arith.mulf %2, %2 : vector<8x512xf32>
    %cst_13 = arith.constant dense<0.000000e+00> : vector<8xf32>
    %14 = vector.multi_reduction <add>, %13, %cst_13 [1] : vector<8x512xf32> to vector<8xf32>
    %15 = vector.shape_cast %14 : vector<8xf32> to vector<8x1xf32>
    %16 = arith.addf %12, %15 : vector<8x1xf32>
    %c0_14 = arith.constant 0 : index
    %c0_15 = arith.constant 0 : index
    %17 = vector.load %arg5[%c0_14, %c0_15] : memref<8x1xf32, #tpu.memory_space<vmem>>, vector<8x1xf32>
    tpu.vector_store %arg5[%c0_14, %c0_15], %16 {strides = array<i32>} : memref<8x1xf32, #tpu.memory_space<vmem>>, vector<8x1xf32>,
    return
  }
  func.func @transform_0(%arg0: i32) -> (i32, i32) {
    %c0_i32 = arith.constant 0 : i32
    %c0_i32_0 = arith.constant 0 : i32
    %c0_i32_1 = arith.constant 0 : i32
    return %c0_i32, %c0_i32_0 : i32, i32
  }
  func.func @transform_1(%arg0: i32) -> (i32, i32) {
    %c0_i32 = arith.constant 0 : i32
    %c0_i32_0 = arith.constant 0 : i32
    return %c0_i32, %arg0 : i32, i32
  }
  func.func @transform_2(%arg0: i32) -> (i32, i32) {
    %c0_i32 = arith.constant 0 : i32
    %c0_i32_0 = arith.constant 0 : i32
    return %c0_i32, %arg0 : i32, i32
  }
  func.func @transform_3(%arg0: i32) -> (i32, i32) {
    %c0_i32 = arith.constant 0 : i32
    %c0_i32_0 = arith.constant 0 : i32
    %c0_i32_1 = arith.constant 0 : i32
    return %c0_i32, %c0_i32_0 : i32, i32
  }
  func.func @transform_4(%arg0: i32) -> (i32, i32) {
    %c0_i32 = arith.constant 0 : i32
    %c0_i32_0 = arith.constant 0 : i32
    %c0_i32_1 = arith.constant 0 : i32
    return %c0_i32, %c0_i32_0 : i32, i32
  }
}

module attributes {stable_mosaic.version = 11 : i64} {
  func.func @_bn_apply_kernel(%arg0: i32, %arg1: memref<8x512xf32, #tpu.memory_space<vmem>>, %arg2: memref<8x1xf32, #tpu.memory_space<vmem>>, %arg3: memref<8x1xf32, #tpu.memory_space<vmem>>, %arg4: memref<8x512xf32, #tpu.memory_space<vmem>>) attributes {dimension_semantics = [#tpu.dimension_semantics<parallel>], iteration_bounds = array<i64: 4>, scalar_prefetch = 0 : i64, scratch_operands = 0 : i64, tpu.core_type = #tpu.core_type<tc>, window_params = [{transform_indices = @transform_0, window_bounds = array<i64: 8, 512>}, {pipeline_mode = #tpu.pipeline_mode<synchronous>, transform_indices = @transform_1, window_bounds = array<i64: 8, 1>}, {pipeline_mode = #tpu.pipeline_mode<synchronous>, transform_indices = @transform_2, window_bounds = array<i64: 8, 1>}, {transform_indices = @transform_3, window_bounds = array<i64: 8, 512>}]} {
    %c0 = arith.constant 0 : index
    %c0_0 = arith.constant 0 : index
    %0 = vector.load %arg1[%c0, %c0_0] : memref<8x512xf32, #tpu.memory_space<vmem>>, vector<8x512xf32>
    %c0_1 = arith.constant 0 : index
    %c0_2 = arith.constant 0 : index
    %1 = vector.load %arg2[%c0_1, %c0_2] : memref<8x1xf32, #tpu.memory_space<vmem>>, vector<8x1xf32>
    %2 = vector.broadcast %1 : vector<8x1xf32> to vector<8x512xf32>
    %3 = arith.mulf %0, %2 : vector<8x512xf32>
    %c0_3 = arith.constant 0 : index
    %c0_4 = arith.constant 0 : index
    %4 = vector.load %arg3[%c0_3, %c0_4] : memref<8x1xf32, #tpu.memory_space<vmem>>, vector<8x1xf32>
    %5 = vector.broadcast %4 : vector<8x1xf32> to vector<8x512xf32>
    %6 = arith.addf %3, %5 : vector<8x512xf32>
    %cst = arith.constant 0.000000e+00 : f32
    %7 = vector.broadcast %cst : f32 to vector<8x512xf32>
    %8 = arith.maximumf %6, %7 : vector<8x512xf32>
    %c0_5 = arith.constant 0 : index
    %c0_6 = arith.constant 0 : index
    %9 = vector.load %arg4[%c0_5, %c0_6] : memref<8x512xf32, #tpu.memory_space<vmem>>, vector<8x512xf32>
    tpu.vector_store %arg4[%c0_5, %c0_6], %8 {strides = array<i32>} : memref<8x512xf32, #tpu.memory_space<vmem>>, vector<8x512xf32>,
    return
  }
  func.func @transform_0(%arg0: i32) -> (i32, i32) {
    %c0_i32 = arith.constant 0 : i32
    %c0_i32_0 = arith.constant 0 : i32
    return %c0_i32, %arg0 : i32, i32
  }
  func.func @transform_1(%arg0: i32) -> (i32, i32) {
    %c0_i32 = arith.constant 0 : i32
    %c0_i32_0 = arith.constant 0 : i32
    %c0_i32_1 = arith.constant 0 : i32
    return %c0_i32, %c0_i32_0 : i32, i32
  }
  func.func @transform_2(%arg0: i32) -> (i32, i32) {
    %c0_i32 = arith.constant 0 : i32
    %c0_i32_0 = arith.constant 0 : i32
    %c0_i32_1 = arith.constant 0 : i32
    return %c0_i32, %c0_i32_0 : i32, i32
  }
  func.func @transform_3(%arg0: i32) -> (i32, i32) {
    %c0_i32 = arith.constant 0 : i32
    %c0_i32_0 = arith.constant 0 : i32
    return %c0_i32, %arg0 : i32, i32
  }
}

module attributes {stable_mosaic.version = 11 : i64} {
  func.func @_matmul_tanh_kernel(%arg0: i32, %arg1: memref<1x128xbf16, #tpu.memory_space<vmem>>, %arg2: memref<128x512xbf16, #tpu.memory_space<vmem>>, %arg3: memref<1x512xf32, #tpu.memory_space<vmem>>) attributes {dimension_semantics = [#tpu.dimension_semantics<parallel>], iteration_bounds = array<i64: 13>, scalar_prefetch = 0 : i64, scratch_operands = 0 : i64, tpu.core_type = #tpu.core_type<tc>, window_params = [{pipeline_mode = #tpu.pipeline_mode<synchronous>, transform_indices = @transform_0, window_bounds = array<i64: 1, 128>}, {transform_indices = @transform_1, window_bounds = array<i64: 128, 512>}, {transform_indices = @transform_2, window_bounds = array<i64: 1, 512>}]} {
    %c0 = arith.constant 0 : index
    %c0_0 = arith.constant 0 : index
    %0 = vector.load %arg1[%c0, %c0_0] : memref<1x128xbf16, #tpu.memory_space<vmem>>, vector<1x128xbf16>
    %c0_1 = arith.constant 0 : index
    %c0_2 = arith.constant 0 : index
    %1 = vector.load %arg2[%c0_1, %c0_2] : memref<128x512xbf16, #tpu.memory_space<vmem>>, vector<128x512xbf16>
    %cst = arith.constant dense<0.000000e+00> : vector<1x512xf32>
    %2 = tpu.matmul %0, %1, %cst {dimension_numbers = #tpu.dot_dimension_numbers<[1], [0], [0], [1], [0, 0, 1, 1], [], []>} : vector<1x128xbf16>, vector<128x512xbf16>, vector<1x512xf32> -> vector<1x512xf32>
    %3 = math.tanh %2 : vector<1x512xf32>
    %c0_3 = arith.constant 0 : index
    %c0_4 = arith.constant 0 : index
    %4 = vector.load %arg3[%c0_3, %c0_4] : memref<1x512xf32, #tpu.memory_space<vmem>>, vector<1x512xf32>
    tpu.vector_store %arg3[%c0_3, %c0_4], %3 {strides = array<i32>} : memref<1x512xf32, #tpu.memory_space<vmem>>, vector<1x512xf32>,
    return
  }
  func.func @transform_0(%arg0: i32) -> (i32, i32) {
    %c0_i32 = arith.constant 0 : i32
    %c0_i32_0 = arith.constant 0 : i32
    %c0_i32_1 = arith.constant 0 : i32
    return %c0_i32, %c0_i32_0 : i32, i32
  }
  func.func @transform_1(%arg0: i32) -> (i32, i32) {
    %c0_i32 = arith.constant 0 : i32
    %c0_i32_0 = arith.constant 0 : i32
    return %c0_i32, %arg0 : i32, i32
  }
  func.func @transform_2(%arg0: i32) -> (i32, i32) {
    %c0_i32 = arith.constant 0 : i32
    %c0_i32_0 = arith.constant 0 : i32
    return %c0_i32, %arg0 : i32, i32
  }
}

</mosaic_0001>

<bundles_post_ra>
// kernel: _generator_forward.8
= control target key start
LH: loop header
LB: loop body
LE: loop exit
PB: predicated region body
PF: predicated region fallthrough
CT: control target
= control target key end

     0   :  { %v89_v0 = vmov 0   ;;  %s158_s1 = inlined_call_operand.vmem [shape: f32[32,1], index: 1, kind: input, shape index: {}]   ;;  %s159_s2 = inlined_call_operand.vmem [shape: f32[32,1], index: 2, kind: input, shape index: {}]   ;;  %s160_s0 = inlined_call_operand.vmem [shape: f32[32,128], index: 0, kind: input, shape index: {}]   ;;  %s161_s3 = inlined_call_operand.vmem [shape: f32[32,128], index: 3, kind: output, shape index: {}]  }
   0x1   :  { %88 = vset.pattern.permute.xlu1 %v89_v0  ;;  %87 = vset.pattern.permute.xlu0 %v89_v0  ;;  %v20_v1 = vld [vmem:[%s158_s1 + $0x10] sm:$0xff]  ;;  %v18_v2 = vld [vmem:[%s158_s1] sm:$0xff]  ;;  %v21_v3 = vld [vmem:[%s158_s1 + $0x18] sm:$0xff] }
   0x2   :  { %34 = vperm.xlu1 %88, %v20_v1   ;;  %24 = vperm.xlu0 %87, %v18_v2   ;;  %v19_v4 = vld [vmem:[%s158_s1 + $0x8] sm:$0xff]  ;;  %v46_v6 = vld [vmem:[%s159_s2] sm:$0xff]  ;;  %v49_v7 = vld [vmem:[%s159_s2 + $0x18] sm:$0xff] }
   0x3   :  { %v47_v5 = vld [vmem:[%s159_s2 + $0x8] sm:$0xff]  ;;  %v48_v8 = vld [vmem:[%s159_s2 + $0x10] sm:$0xff]  ;;  %v14_v11 = vld [vmem:[%s160_s0] sm:$0xff] }
   0x4   :  { %v15_v14 = vld [vmem:[%s160_s0 + $0x8] sm:$0xff]  ;;  %v16_v17 = vld [vmem:[%s160_s0 + $0x10] sm:$0xff]  ;;  %v17_v18 = vld [vmem:[%s160_s0 + $0x18] sm:$0xff] }
   0x6   :  { %39 = vperm.xlu1 %88, %v21_v3   ;;  %29 = vperm.xlu0 %87, %v19_v4  }
   0xa   :  { %57 = vperm.xlu1 %88, %v47_v5   ;;  %52 = vperm.xlu0 %87, %v46_v6  }
   0xe   :  { %67 = vperm.xlu1 %88, %v49_v7   ;;  %62 = vperm.xlu0 %87, %v48_v8  }
  0x7d   :  { %v35_v9 = vpop.permute.xlu1 %34  ;;  %v25_v10 = vpop.permute.xlu0 %24 }
  0x7e   :  { %v42_v15 = vmul.f32 %v25_v10, %v14_v11  ;;  %v44_v23 = vmul.f32 %v35_v9, %v16_v17 }
  0x81   :  { %v40_v12 = vpop.permute.xlu1 %39  ;;  %v30_v13 = vpop.permute.xlu0 %29 }
  0x82   :  { %v43_v16 = vmul.f32 %v30_v13, %v15_v14  ;;  %v45_v24 = vmul.f32 %v40_v12, %v17_v18 }
  0x85   :  { %v58_v19 = vpop.permute.xlu1 %57  ;;  %v53_v20 = vpop.permute.xlu0 %52 }
  0x86   :  { %v71_v21 = vadd.f32 %v58_v19, %v43_v16  ;;  %v70_v22 = vadd.f32 %v53_v20, %v42_v15 }
  0x88   :  { %v75_v25 = vmax.f32 %v71_v21, 0.0  ;;  %v74_v26 = vmax.f32 %v70_v22, 0.0 }
  0x89   :  { %v68_v27 = vpop.permute.xlu1 %67  ;;  %v63_v28 = vpop.permute.xlu0 %62 }
  0x8a   :  { %79 = vst [vmem:[%s161_s3 + $0x8] sm:$0xff] %v75_v25  ;;  %78 = vst [vmem:[%s161_s3] sm:$0xff] %v74_v26  ;;  %v73_v29 = vadd.f32 %v68_v27, %v45_v24  ;;  %v72_v30 = vadd.f32 %v63_v28, %v44_v23 }
  0x8c   :  { %v77_v31 = vmax.f32 %v73_v29, 0.0  ;;  %v76_v32 = vmax.f32 %v72_v30, 0.0 }
  0x8e   :  { %81 = vst [vmem:[%s161_s3 + $0x18] sm:$0xff] %v77_v31  ;;  %80 = vst [vmem:[%s161_s3 + $0x10] sm:$0xff] %v76_v32 }

// kernel: _generator_forward.7
= control target key start
LH: loop header
LB: loop body
LE: loop exit
PB: predicated region body
PF: predicated region fallthrough
CT: control target
= control target key end

     0   :  { %v542_v0 = vmov 0   ;;  %vm257_vm0 = vcmask 64512   ;;  %vm264_vm1 = vcmask 1043456   ;;  %vm374_vm2 = vcmask 7168   ;;  %s779_s1 = inlined_call_operand.vmem [shape: bf16[392,128], index: 1, kind: input, shape index: {}]   ;;  %s780_s0 = inlined_call_operand.vmem [shape: bf16[32,392], index: 0, kind: input, shape index: {}]   ;;  %s781_s3 = inlined_call_operand.vmem [shape: f32[32,1], index: 3, kind: output, shape index: {1}]   ;;  %s782_s2 = inlined_call_operand.vmem [shape: f32[32,128], index: 2, kind: output, shape index: {0}]   ;;  %s783_s4 = inlined_call_operand.vmem [shape: f32[32,1], index: 4, kind: output, shape index: {2}]  }
   0x1   :  { %317 = vmatprep.subr.bf16.mxu1 %v542_v0  ;;  %v505_v1 = vld [vmem:[%s779_s1 + $0x78] sm:$0xff]   ;;  %v508_v4 = vld [vmem:[%s779_s1 + $0x70] sm:$0xff]   ;;  %v511_v7 = vld [vmem:[%s779_s1 + $0x68] sm:$0xff]   ;;  %v543_v35 = vmov 0.0  }
   0x2   :  { %v506_v2 = vld [vmem:[%s779_s1 + $0xb8] sm:$0xff]   ;;  %475 = vmatprep.subr.bf16.mxu0 %v505_v1  ;;  %v509_v5 = vld [vmem:[%s779_s1 + $0xb0] sm:$0xff]   ;;  %v512_v8 = vld [vmem:[%s779_s1 + $0xa8] sm:$0xff]   ;;  %375 = vst.msk [vmem:[%s781_s3] sm:$0xff] %vm374_vm2, %v543_v35 }
   0x3   :  { %v507_v3 = vld [vmem:[%s779_s1 + $0x38] sm:$0xff]   ;;  %318 = vmatpush1.bf16.msra.mxu1 %v506_v2  ;;  %v510_v6 = vld [vmem:[%s779_s1 + $0x30] sm:$0xff]   ;;  %v513_v9 = vld [vmem:[%s779_s1 + $0x28] sm:$0xff]   ;;  %376 = vst.msk [vmem:[%s781_s3 + $0x8] sm:$0xff] %vm374_vm2, %v543_v35 }
   0x4   :  { %476 = vmatpush3.bf16.msra.mxu0 %v507_v3  ;;  %319 = vmatprep.subr.bf16.mxu1 %v542_v0  ;;  %v514_v10 = vld [vmem:[%s779_s1 + $0x60] sm:$0xff]   ;;  %v517_v13 = vld [vmem:[%s779_s1 + $0x58] sm:$0xff]   ;;  %v520_v16 = vld [vmem:[%s779_s1 + $0x50] sm:$0xff]   ;;  %377 = vst.msk [vmem:[%s781_s3 + $0x10] sm:$0xff] %vm374_vm2, %v543_v35 }
   0x5   :  { %477 = vmatprep.subr.bf16.mxu0 %v508_v4  ;;  %v515_v11 = vld [vmem:[%s779_s1 + $0xa0] sm:$0xff]   ;;  %v518_v14 = vld [vmem:[%s779_s1 + $0x98] sm:$0xff]   ;;  %v521_v17 = vld [vmem:[%s779_s1 + $0x90] sm:$0xff]   ;;  %378 = vst.msk [vmem:[%s781_s3 + $0x18] sm:$0xff] %vm374_vm2, %v543_v35 }
   0x6   :  { %v516_v12 = vld [vmem:[%s779_s1 + $0x20] sm:$0xff]   ;;  %v519_v15 = vld [vmem:[%s779_s1 + $0x18] sm:$0xff]   ;;  %v522_v18 = vld [vmem:[%s779_s1 + $0x10] sm:$0xff]   ;;  %379 = vst.msk [vmem:[%s783_s4] sm:$0xff] %vm374_vm2, %v543_v35 }
   0x7   :  { %320 = vmatpush1.bf16.msra.mxu1 %v509_v5  ;;  %v523_v19 = vld [vmem:[%s779_s1 + $0x48] sm:$0xff]   ;;  %v526_v22 = vld [vmem:[%s779_s1 + $0x40] sm:$0xff]   ;;  %380 = vst.msk [vmem:[%s783_s4 + $0x8] sm:$0xff] %vm374_vm2, %v543_v35  ;;  %381 = vst.msk [vmem:[%s783_s4 + $0x10] sm:$0xff] %vm374_vm2, %v543_v35 }
   0x8   :  { %478 = vmatpush3.bf16.msra.mxu0 %v510_v6  ;;  %321 = vmatprep.subr.bf16.mxu1 %v542_v0  ;;  %v524_v20 = vld [vmem:[%s779_s1 + $0x88] sm:$0xff]   ;;  %v531_v23 = vld [vmem:[%s780_s0 + $0x4] ss:$16 sps:$4 sm:$0xff]   ;;  %v532_v27 = vld [vmem:[%s779_s1 + $0xc0] ss:$0 sps:$4 sm:$0xff]   ;;  %382 = vst.msk [vmem:[%s783_s4 + $0x18] sm:$0xff] %vm374_vm2, %v543_v35 }
   0x9   :  { %479 = vmatprep.subr.bf16.mxu0 %v511_v7  ;;  %v525_v21 = vld [vmem:[%s779_s1 + $0x8] sm:$0xff]   ;;  %v527_v24 = vld [vmem:[%s779_s1 + $0x80] sm:$0xff]   ;;  %300 = vmatprep.mubr.bf16.mxu0 %v531_v23  ;;  %v266_v29 = vsel %vm264_vm1, %v532_v27, 0 }
   0xa   :  { %v535_v25 = vld [vmem:[%s780_s0 + $0xc] ss:$16 sps:$4 sm:$0xff]   ;;  %v528_v26 = vld [vmem:[%s779_s1] sm:$0xff]   ;;  %v533_v31 = vld [vmem:[%s780_s0 + $0x8] ss:$16 sps:$4 sm:$0xff]  }
   0xb   :  { %322 = vmatpush1.bf16.msra.mxu1 %v512_v8  ;;  %473 = vmatprep.mubr.msk.bf16.mxu1 %vm257_vm0, %v535_v25  ;;  %v529_v28 = vld [vmem:[%s780_s0] ss:$16 sps:$4 sm:$0xff]   ;;  %v536_v30 = vld [vmem:[%s780_s0 + $0x24] ss:$16 sps:$4 sm:$0xff]   ;;  %v539_v32 = vld [vmem:[%s780_s0 + $0x2c] ss:$16 sps:$4 sm:$0xff]  }
   0xc   :  { %480 = vmatpush3.bf16.msra.mxu0 %v513_v9  ;;  %323 = vmatprep.subr.bf16.mxu1 %v542_v0  ;;  %v538_v33 = vld [vmem:[%s780_s0 + $0x20] ss:$16 sps:$4 sm:$0xff]   ;;  %v541_v34 = vld [vmem:[%s780_s0 + $0x28] ss:$16 sps:$4 sm:$0xff]  }
   0xd   :  { %481 = vmatprep.subr.bf16.mxu0 %v514_v10  ;;  %v404_v3 = vld [vmem:[%s783_s4] sm:$0xff]  ;;  %v384_v8 = vld [vmem:[%s781_s3 + $0x8] sm:$0xff] }
   0xe   :  { %v405_v5 = vld [vmem:[%s783_s4 + $0x8] sm:$0xff] }
   0xf   :  { %324 = vmatpush1.bf16.msra.mxu1 %v515_v11  ;;  %v385_v11 = vld [vmem:[%s781_s3 + $0x10] sm:$0xff] }
  0x10   :  { %482 = vmatpush3.bf16.msra.mxu0 %v516_v12  ;;  %325 = vmatprep.subr.bf16.mxu1 %v542_v0 }
  0x11   :  { %483 = vmatprep.subr.bf16.mxu0 %v517_v13 }
  0x13   :  { %326 = vmatpush1.bf16.msra.mxu1 %v518_v14  ;;  %v406_v14 = vld [vmem:[%s783_s4 + $0x10] sm:$0xff] }
  0x14   :  { %484 = vmatpush3.bf16.msra.mxu0 %v519_v15  ;;  %327 = vmatprep.subr.bf16.mxu1 %v542_v0 }
  0x15   :  { %485 = vmatprep.subr.bf16.mxu0 %v520_v16 }
  0x17   :  { %328 = vmatpush1.bf16.msra.mxu1 %v521_v17  ;;  %v386_v17 = vld [vmem:[%s781_s3 + $0x18] sm:$0xff] }
  0x18   :  { %486 = vmatpush3.bf16.msra.mxu0 %v522_v18  ;;  %329 = vmatprep.subr.bf16.mxu1 %v542_v0 }
  0x19   :  { %487 = vmatprep.subr.bf16.mxu0 %v523_v19 }
  0x1b   :  { %330 = vmatpush1.bf16.msra.mxu1 %v524_v20 }
  0x1c   :  { %488 = vmatpush3.bf16.msra.mxu0 %v525_v21  ;;  %331 = vmatprep.subr.bf16.mxu1 %v542_v0  ;;  %v407_v21 = vld [vmem:[%s783_s4 + $0x18] sm:$0xff] }
  0x1d   :  { %489 = vmatprep.subr.bf16.mxu0 %v526_v22 }
  0x1f   :  { %332 = vmatpush1.bf16.msra.mxu1 %v527_v24 }
  0x20   :  { %490 = vmatpush3.bf16.msra.mxu0 %v528_v26  ;;  %347 = vmatprep.subr.bf16.mxu1 %v542_v0  ;;  %v383_v0 = vld [vmem:[%s781_s3] sm:$0xff] }
  0x23   :  { %301 = vmatmul.mubr.bf16.vlgmr.msra.gmra.mxu0 %v529_v28  ;;  %348 = vmatpush2.bf16.msra.mxu1 %v266_v29 }
  0x24   :  { %308 = vmatprep.mubr.bf16.mxu0 %v536_v30 }
  0x26   :  { %350 = vmatmul.mubr.bf16.vlgmr.msra.gmra.mxu1 %v533_v31 }
  0x27   :  { %474 = vmatprep.mubr.msk.bf16.mxu1 %vm257_vm0, %v539_v32 }
  0x2b   :  { %309 = vmatmul.mubr.bf16.gmra.mxu0 %v538_v33 }
  0x2e   :  { %358 = vmatmul.mubr.bf16.gmra.mxu1 %v541_v34 }
  0xe3   :  { %v491_v36 = vpop.f32.mrf.mxu0 }
  0xe5   :  { %v492_v37 = vpop.f32.mrf.mxu0 }
  0xe6   :  { %v493_v38 = vadd.f32 %v492_v37, %v491_v36  ;;  %v351_v39 = vpop.f32.mrf.mxu1 }
  0xe7   :  { %v494_v40 = vpop.f32.mrf.mxu0 }
  0xe8   :  { %v352_v41 = vadd.f32 %v493_v38, %v351_v39  ;;  %v353_v42 = vpop.f32.mrf.mxu1 }
  0xe9   :  { %v495_v43 = vpop.f32.mrf.mxu0 }
  0xea   :  { %366 = vst [vmem:[%s782_s2] sm:$0xff] %v352_v41  ;;  %v496_v44 = vadd.f32 %v495_v43, %v494_v40  ;;  %v354_v45 = vpop.f32.mrf.mxu1  ;;  %387 = vadd.xlane.f32.xlu0 %v352_v41  ;;  %v408_v49 = vmul.f32 %v352_v41, %v352_v41 }
  0xeb   :  { %v497_v46 = vpop.f32.mrf.mxu0 }
  0xec   :  { %v355_v47 = vadd.f32 %v496_v44, %v354_v45  ;;  %v356_v48 = vpop.f32.mrf.mxu1 }
  0xed   :  { %v498_v50 = vpop.f32.mrf.mxu0 }
  0xee   :  { %367 = vst [vmem:[%s782_s2 + $0x8] sm:$0xff] %v355_v47  ;;  %v499_v51 = vadd.f32 %v498_v50, %v497_v46  ;;  %v359_v52 = vpop.f32.mrf.mxu1  ;;  %412 = vadd.xlane.f32.xlu0 %v408_v49  ;;  %v409_v53 = vmul.f32 %v355_v47, %v355_v47 }
  0xef   :  { %v500_v54 = vpop.f32.mrf.mxu0 }
  0xf0   :  { %v360_v55 = vadd.f32 %v499_v51, %v359_v52  ;;  %v361_v56 = vpop.f32.mrf.mxu1  ;;  %414 = vadd.xlane.f32.xlu1 %v409_v53 }
  0xf1   :  { %v501_v57 = vpop.f32.mrf.mxu0 }
  0xf2   :  { %368 = vst [vmem:[%s782_s2 + $0x10] sm:$0xff] %v360_v55  ;;  %v502_v58 = vadd.f32 %v501_v57, %v500_v54  ;;  %v362_v59 = vpop.f32.mrf.mxu1  ;;  %389 = vadd.xlane.f32.xlu0 %v355_v47  ;;  %v410_v62 = vmul.f32 %v360_v55, %v360_v55 }
  0xf4   :  { %v363_v60 = vadd.f32 %v502_v58, %v362_v59  ;;  %v364_v61 = vpop.f32.mrf.mxu1  ;;  %391 = vadd.xlane.f32.xlu1 %v360_v55 }
  0xf6   :  { %369 = vst [vmem:[%s782_s2 + $0x18] sm:$0xff] %v363_v60  ;;  %416 = vadd.xlane.f32.xlu0 %v410_v62  ;;  %v411_v63 = vmul.f32 %v363_v60, %v363_v60 }
  0xf8   :  { %393 = vadd.xlane.f32.xlu1 %v363_v60 }
  0xfc   :  { %418 = vadd.xlane.f32.xlu1 %v411_v63 }
 0x173   :  { %v388_v1 = vpop.xlane.xlu0 %387 }
 0x174   :  { %v395_v2 = vadd.f32 %v388_v1, %v383_v0 }
 0x176   :  { %400 = vst.msk [vmem:[%s781_s3] sm:$0xff] %vm374_vm2, %v395_v2 }
 0x177   :  { %v413_v4 = vpop.xlane.xlu0 %412 }
 0x178   :  { %v420_v6 = vadd.f32 %v413_v4, %v404_v3 }
 0x179   :  { %v415_v7 = vpop.xlane.xlu1 %414 }
 0x17a   :  { %424 = vst.msk [vmem:[%s783_s4] sm:$0xff] %vm374_vm2, %v420_v6  ;;  %v421_v9 = vadd.f32 %v415_v7, %v405_v5 }
 0x17b   :  { %v390_v10 = vpop.xlane.xlu0 %389 }
 0x17c   :  { %425 = vst.msk [vmem:[%s783_s4 + $0x8] sm:$0xff] %vm374_vm2, %v421_v9  ;;  %v396_v12 = vadd.f32 %v390_v10, %v384_v8 }
 0x17d   :  { %v392_v13 = vpop.xlane.xlu1 %391 }
 0x17e   :  { %401 = vst.msk [vmem:[%s781_s3 + $0x8] sm:$0xff] %vm374_vm2, %v396_v12  ;;  %v397_v15 = vadd.f32 %v392_v13, %v385_v11 }
 0x17f   :  { %v417_v16 = vpop.xlane.xlu0 %416 }
 0x180   :  { %402 = vst.msk [vmem:[%s781_s3 + $0x10] sm:$0xff] %vm374_vm2, %v397_v15  ;;  %v422_v18 = vadd.f32 %v417_v16, %v406_v14 }
 0x181   :  { %v394_v19 = vpop.xlane.xlu1 %393 }
 0x182   :  { %426 = vst.msk [vmem:[%s783_s4 + $0x10] sm:$0xff] %vm374_vm2, %v422_v18  ;;  %v398_v20 = vadd.f32 %v394_v19, %v386_v17 }
 0x184   :  { %403 = vst.msk [vmem:[%s781_s3 + $0x18] sm:$0xff] %vm374_vm2, %v398_v20 }
 0x185   :  { %v419_v22 = vpop.xlane.xlu1 %418 }
 0x186   :  { %v423_v23 = vadd.f32 %v419_v22, %v407_v21 }
 0x188   :  { %427 = vst.msk [vmem:[%s783_s4 + $0x18] sm:$0xff] %vm374_vm2, %v423_v23 }

// kernel: _generator_forward.9
= control target key start
LH: loop header
LB: loop body
LE: loop exit
PB: predicated region body
PF: predicated region fallthrough
CT: control target
= control target key end

     0   :  { %vm990_vm0 = vcmask 7168   ;;  %s1877_s1 = inlined_call_operand.vmem [shape: bf16[512,512], index: 1, kind: input, shape index: {}]   ;;  %s1878_s0 = inlined_call_operand.vmem [shape: bf16[16,512], index: 0, kind: input, shape index: {}]   ;;  %s1879_s3 = inlined_call_operand.vmem [shape: f32[16,1], index: 3, kind: output, shape index: {1}]   ;;  %s1880_s2 = inlined_call_operand.vmem [shape: f32[16,512], index: 2, kind: output, shape index: {0}]   ;;  %s1881_s4 = inlined_call_operand.vmem [shape: f32[16,1], index: 4, kind: output, shape index: {2}]  }
   0x1   :  { %v1181_v0 = vld [vmem:[%s1877_s1 + $0xe4] ss:$16 sps:$4 sm:$0xff]   ;;  %v1185_v2 = vld [vmem:[%s1877_s1 + $0xe0] ss:$16 sps:$4 sm:$0xff]   ;;  %v1282_v51 = vld [vmem:[%s1878_s0 + $0xc] ss:$16 sps:$4 sm:$0xff]  }
   0x2   :  { %v1183_v1 = vld [vmem:[%s1877_s1 + $0x2e4] ss:$16 sps:$4 sm:$0xff]   ;;  %806 = vmatprep.subr.bf16.mxu0 %v1181_v0  ;;  %v1186_v3 = vld [vmem:[%s1877_s1 + $0x2e0] ss:$16 sps:$4 sm:$0xff]   ;;  %881 = vmatprep.mubr.bf16.mxu1 %v1282_v51 }
   0x3   :  { %849 = vmatprep.subr.bf16.mxu1 %v1183_v1  ;;  %v1187_v4 = vld [vmem:[%s1877_s1 + $0xc4] ss:$16 sps:$4 sm:$0xff]   ;;  %807 = vmatpush1.bf16.msra.mxu0 %v1185_v2  ;;  %v1191_v6 = vld [vmem:[%s1877_s1 + $0xc0] ss:$16 sps:$4 sm:$0xff]   ;;  %v1285_v2 = vld [vmem:[%s1877_s1 + $0xec] ss:$16 sps:$4 sm:$0xff]  }
   0x4   :  { %850 = vmatpush1.bf16.msra.mxu1 %v1186_v3  ;;  %v1189_v5 = vld [vmem:[%s1877_s1 + $0x2c4] ss:$16 sps:$4 sm:$0xff]   ;;  %808 = vmatprep.subr.bf16.mxu0 %v1187_v4  ;;  %v1192_v7 = vld [vmem:[%s1877_s1 + $0x2c0] ss:$16 sps:$4 sm:$0xff]   ;;  %v1288_v3 = vld [vmem:[%s1877_s1 + $0x2ec] ss:$16 sps:$4 sm:$0xff]  }
   0x5   :  { %851 = vmatprep.subr.bf16.mxu1 %v1189_v5  ;;  %v1193_v8 = vld [vmem:[%s1877_s1 + $0xa4] ss:$16 sps:$4 sm:$0xff]   ;;  %v1197_v10 = vld [vmem:[%s1877_s1 + $0xa0] ss:$16 sps:$4 sm:$0xff]   ;;  %v1617_v5 = vld [vmem:[%s1878_s0 + $0x8] ss:$16 sps:$4 sm:$0xff]  }
   0x6   :  { %v1195_v9 = vld [vmem:[%s1877_s1 + $0x2a4] ss:$16 sps:$4 sm:$0xff]   ;;  %v1198_v11 = vld [vmem:[%s1877_s1 + $0x2a0] ss:$16 sps:$4 sm:$0xff]  }
   0x7   :  { %809 = vmatpush1.bf16.msra.mxu0 %v1191_v6  ;;  %v1199_v12 = vld [vmem:[%s1877_s1 + $0x84] ss:$16 sps:$4 sm:$0xff]   ;;  %v1203_v14 = vld [vmem:[%s1877_s1 + $0x80] ss:$16 sps:$4 sm:$0xff]   ;;  %v1283_v6 = vld [vmem:[%s1877_s1 + $0xe8] ss:$16 sps:$4 sm:$0xff]  }
   0x8   :  { %852 = vmatpush1.bf16.msra.mxu1 %v1192_v7  ;;  %810 = vmatprep.subr.bf16.mxu0 %v1193_v8  ;;  %v1201_v13 = vld [vmem:[%s1877_s1 + $0x284] ss:$16 sps:$4 sm:$0xff]   ;;  %v1204_v15 = vld [vmem:[%s1877_s1 + $0x280] ss:$16 sps:$4 sm:$0xff]   ;;  %v1286_v7 = vld [vmem:[%s1877_s1 + $0x2e8] ss:$16 sps:$4 sm:$0xff]  }
   0x9   :  { %853 = vmatprep.subr.bf16.mxu1 %v1195_v9  ;;  %v1205_v16 = vld [vmem:[%s1877_s1 + $0x64] ss:$16 sps:$4 sm:$0xff]   ;;  %v1209_v18 = vld [vmem:[%s1877_s1 + $0x60] ss:$16 sps:$4 sm:$0xff]   ;;  %v1291_v8 = vld [vmem:[%s1877_s1 + $0xcc] ss:$16 sps:$4 sm:$0xff]  }
   0xa   :  { %v1207_v17 = vld [vmem:[%s1877_s1 + $0x264] ss:$16 sps:$4 sm:$0xff]   ;;  %v1210_v19 = vld [vmem:[%s1877_s1 + $0x260] ss:$16 sps:$4 sm:$0xff]   ;;  %v1294_v9 = vld [vmem:[%s1877_s1 + $0x2cc] ss:$16 sps:$4 sm:$0xff]  }
   0xb   :  { %811 = vmatpush1.bf16.msra.mxu0 %v1197_v10  ;;  %v1211_v20 = vld [vmem:[%s1877_s1 + $0x44] ss:$16 sps:$4 sm:$0xff]   ;;  %v1215_v22 = vld [vmem:[%s1877_s1 + $0x40] ss:$16 sps:$4 sm:$0xff]   ;;  %v1289_v10 = vld [vmem:[%s1877_s1 + $0xc8] ss:$16 sps:$4 sm:$0xff]  }
   0xc   :  { %854 = vmatpush1.bf16.msra.mxu1 %v1198_v11  ;;  %812 = vmatprep.subr.bf16.mxu0 %v1199_v12  ;;  %v1213_v21 = vld [vmem:[%s1877_s1 + $0x244] ss:$16 sps:$4 sm:$0xff]   ;;  %v1216_v23 = vld [vmem:[%s1877_s1 + $0x240] ss:$16 sps:$4 sm:$0xff]   ;;  %v1292_v11 = vld [vmem:[%s1877_s1 + $0x2c8] ss:$16 sps:$4 sm:$0xff]  }
   0xd   :  { %855 = vmatprep.subr.bf16.mxu1 %v1201_v13  ;;  %v1217_v24 = vld [vmem:[%s1877_s1 + $0x24] ss:$16 sps:$4 sm:$0xff]   ;;  %v1221_v26 = vld [vmem:[%s1877_s1 + $0x20] ss:$16 sps:$4 sm:$0xff]   ;;  %v1297_v12 = vld [vmem:[%s1877_s1 + $0xac] ss:$16 sps:$4 sm:$0xff]  }
   0xe   :  { %v1219_v25 = vld [vmem:[%s1877_s1 + $0x224] ss:$16 sps:$4 sm:$0xff]   ;;  %v1222_v27 = vld [vmem:[%s1877_s1 + $0x220] ss:$16 sps:$4 sm:$0xff]   ;;  %v1300_v13 = vld [vmem:[%s1877_s1 + $0x2ac] ss:$16 sps:$4 sm:$0xff]  }
   0xf   :  { %813 = vmatpush1.bf16.msra.mxu0 %v1203_v14  ;;  %v1223_v28 = vld [vmem:[%s1877_s1 + $0x4] ss:$16 sps:$4 sm:$0xff]   ;;  %v1227_v30 = vld [vmem:[%s1877_s1] ss:$16 sps:$4 sm:$0xff]   ;;  %v1295_v14 = vld [vmem:[%s1877_s1 + $0xa8] ss:$16 sps:$4 sm:$0xff]  }
  0x10   :  { %856 = vmatpush1.bf16.msra.mxu1 %v1204_v15  ;;  %814 = vmatprep.subr.bf16.mxu0 %v1205_v16  ;;  %v1225_v29 = vld [vmem:[%s1877_s1 + $0x204] ss:$16 sps:$4 sm:$0xff]   ;;  %v1228_v31 = vld [vmem:[%s1877_s1 + $0x200] ss:$16 sps:$4 sm:$0xff]   ;;  %v1298_v15 = vld [vmem:[%s1877_s1 + $0x2a8] ss:$16 sps:$4 sm:$0xff]  }
  0x11   :  { %857 = vmatprep.subr.bf16.mxu1 %v1207_v17  ;;  %v1229_v32 = vld [vmem:[%s1877_s1 + $0x1e4] ss:$16 sps:$4 sm:$0xff]   ;;  %v1233_v34 = vld [vmem:[%s1877_s1 + $0x1e0] ss:$16 sps:$4 sm:$0xff]   ;;  %v1303_v16 = vld [vmem:[%s1877_s1 + $0x8c] ss:$16 sps:$4 sm:$0xff]  }
  0x12   :  { %v1231_v33 = vld [vmem:[%s1877_s1 + $0x3e4] ss:$16 sps:$4 sm:$0xff]   ;;  %v1234_v35 = vld [vmem:[%s1877_s1 + $0x3e0] ss:$16 sps:$4 sm:$0xff]   ;;  %v1306_v17 = vld [vmem:[%s1877_s1 + $0x28c] ss:$16 sps:$4 sm:$0xff]  }
  0x13   :  { %815 = vmatpush1.bf16.msra.mxu0 %v1209_v18  ;;  %v1235_v36 = vld [vmem:[%s1877_s1 + $0x1c4] ss:$16 sps:$4 sm:$0xff]   ;;  %v1239_v38 = vld [vmem:[%s1877_s1 + $0x1c0] ss:$16 sps:$4 sm:$0xff]   ;;  %v1301_v18 = vld [vmem:[%s1877_s1 + $0x88] ss:$16 sps:$4 sm:$0xff]  }
  0x14   :  { %858 = vmatpush1.bf16.msra.mxu1 %v1210_v19  ;;  %816 = vmatprep.subr.bf16.mxu0 %v1211_v20  ;;  %v1237_v37 = vld [vmem:[%s1877_s1 + $0x3c4] ss:$16 sps:$4 sm:$0xff]   ;;  %v1240_v39 = vld [vmem:[%s1877_s1 + $0x3c0] ss:$16 sps:$4 sm:$0xff]   ;;  %v1304_v19 = vld [vmem:[%s1877_s1 + $0x288] ss:$16 sps:$4 sm:$0xff]  }
  0x15   :  { %859 = vmatprep.subr.bf16.mxu1 %v1213_v21  ;;  %v1241_v40 = vld [vmem:[%s1877_s1 + $0x1a4] ss:$16 sps:$4 sm:$0xff]   ;;  %v1245_v42 = vld [vmem:[%s1877_s1 + $0x1a0] ss:$16 sps:$4 sm:$0xff]   ;;  %v1309_v20 = vld [vmem:[%s1877_s1 + $0x6c] ss:$16 sps:$4 sm:$0xff]  }
  0x16   :  { %v1243_v41 = vld [vmem:[%s1877_s1 + $0x3a4] ss:$16 sps:$4 sm:$0xff]   ;;  %v1246_v43 = vld [vmem:[%s1877_s1 + $0x3a0] ss:$16 sps:$4 sm:$0xff]   ;;  %v1312_v21 = vld [vmem:[%s1877_s1 + $0x26c] ss:$16 sps:$4 sm:$0xff]  }
  0x17   :  { %817 = vmatpush1.bf16.msra.mxu0 %v1215_v22  ;;  %v1247_v44 = vld [vmem:[%s1877_s1 + $0x184] ss:$16 sps:$4 sm:$0xff]   ;;  %v1251_v46 = vld [vmem:[%s1877_s1 + $0x180] ss:$16 sps:$4 sm:$0xff]   ;;  %v1307_v22 = vld [vmem:[%s1877_s1 + $0x68] ss:$16 sps:$4 sm:$0xff]  }
  0x18   :  { %860 = vmatpush1.bf16.msra.mxu1 %v1216_v23  ;;  %818 = vmatprep.subr.bf16.mxu0 %v1217_v24  ;;  %v1249_v45 = vld [vmem:[%s1877_s1 + $0x384] ss:$16 sps:$4 sm:$0xff]   ;;  %v1252_v47 = vld [vmem:[%s1877_s1 + $0x380] ss:$16 sps:$4 sm:$0xff]   ;;  %v1310_v23 = vld [vmem:[%s1877_s1 + $0x268] ss:$16 sps:$4 sm:$0xff]  }
  0x19   :  { %861 = vmatprep.subr.bf16.mxu1 %v1219_v25  ;;  %v1253_v48 = vld [vmem:[%s1877_s1 + $0x164] ss:$16 sps:$4 sm:$0xff]   ;;  %v1257_v52 = vld [vmem:[%s1877_s1 + $0x160] ss:$16 sps:$4 sm:$0xff]   ;;  %v1315_v24 = vld [vmem:[%s1877_s1 + $0x4c] ss:$16 sps:$4 sm:$0xff]  }
  0x1a   :  { %v1279_v49 = vld [vmem:[%s1878_s0 + $0x4] ss:$16 sps:$4 sm:$0xff]   ;;  %v1258_v53 = vld [vmem:[%s1877_s1 + $0x360] ss:$16 sps:$4 sm:$0xff]   ;;  %v1318_v25 = vld [vmem:[%s1877_s1 + $0x24c] ss:$16 sps:$4 sm:$0xff]  }
  0x1b   :  { %819 = vmatpush1.bf16.msra.mxu0 %v1221_v26  ;;  %v1255_v50 = vld [vmem:[%s1877_s1 + $0x364] ss:$16 sps:$4 sm:$0xff]   ;;  %838 = vmatprep.mubr.bf16.mxu0 %v1279_v49  ;;  %v1263_v56 = vld [vmem:[%s1877_s1 + $0x140] ss:$16 sps:$4 sm:$0xff]   ;;  %v1313_v26 = vld [vmem:[%s1877_s1 + $0x48] ss:$16 sps:$4 sm:$0xff]  }
  0x1c   :  { %862 = vmatpush1.bf16.msra.mxu1 %v1222_v27  ;;  %820 = vmatprep.subr.bf16.mxu0 %v1223_v28  ;;  %v1259_v54 = vld [vmem:[%s1877_s1 + $0x144] ss:$16 sps:$4 sm:$0xff]   ;;  %v1264_v57 = vld [vmem:[%s1877_s1 + $0x340] ss:$16 sps:$4 sm:$0xff]   ;;  %v1316_v27 = vld [vmem:[%s1877_s1 + $0x248] ss:$16 sps:$4 sm:$0xff]  }
  0x1d   :  { %863 = vmatprep.subr.bf16.mxu1 %v1225_v29  ;;  %v1261_v55 = vld [vmem:[%s1877_s1 + $0x344] ss:$16 sps:$4 sm:$0xff]   ;;  %v1269_v60 = vld [vmem:[%s1877_s1 + $0x120] ss:$16 sps:$4 sm:$0xff]   ;;  %v1321_v28 = vld [vmem:[%s1877_s1 + $0x2c] ss:$16 sps:$4 sm:$0xff]  }
  0x1e   :  { %v1265_v58 = vld [vmem:[%s1877_s1 + $0x124] ss:$16 sps:$4 sm:$0xff]   ;;  %v1270_v61 = vld [vmem:[%s1877_s1 + $0x320] ss:$16 sps:$4 sm:$0xff]   ;;  %v1324_v29 = vld [vmem:[%s1877_s1 + $0x22c] ss:$16 sps:$4 sm:$0xff]  }
  0x1f   :  { %821 = vmatpush1.bf16.msra.mxu0 %v1227_v30  ;;  %v1267_v59 = vld [vmem:[%s1877_s1 + $0x324] ss:$16 sps:$4 sm:$0xff]   ;;  %v1275_v0 = vld [vmem:[%s1877_s1 + $0x100] ss:$16 sps:$4 sm:$0xff]   ;;  %v1319_v30 = vld [vmem:[%s1877_s1 + $0x28] ss:$16 sps:$4 sm:$0xff]  }
  0x20   :  { %864 = vmatpush1.bf16.msra.mxu1 %v1228_v31  ;;  %822 = vmatprep.subr.bf16.mxu0 %v1229_v32  ;;  %v1271_v62 = vld [vmem:[%s1877_s1 + $0x104] ss:$16 sps:$4 sm:$0xff]   ;;  %v1276_v1 = vld [vmem:[%s1877_s1 + $0x300] ss:$16 sps:$4 sm:$0xff]   ;;  %v1322_v31 = vld [vmem:[%s1877_s1 + $0x228] ss:$16 sps:$4 sm:$0xff]  }
  0x21   :  { %865 = vmatprep.subr.bf16.mxu1 %v1231_v33  ;;  %v1273_v63 = vld [vmem:[%s1877_s1 + $0x304] ss:$16 sps:$4 sm:$0xff]   ;;  %v1612_v4 = vld [vmem:[%s1878_s0] ss:$16 sps:$4 sm:$0xff]   ;;  %v1327_v32 = vld [vmem:[%s1877_s1 + $0xc] ss:$16 sps:$4 sm:$0xff]  }
  0x22   :  { %v1330_v33 = vld [vmem:[%s1877_s1 + $0x20c] ss:$16 sps:$4 sm:$0xff]  }
  0x23   :  { %823 = vmatpush2.bf16.msra.mxu0 %v1233_v34  ;;  %v1325_v34 = vld [vmem:[%s1877_s1 + $0x8] ss:$16 sps:$4 sm:$0xff]  }
  0x24   :  { %866 = vmatpush2.bf16.msra.mxu1 %v1234_v35  ;;  %824 = vmatprep.subr.bf16.mxu0 %v1235_v36  ;;  %v1328_v35 = vld [vmem:[%s1877_s1 + $0x208] ss:$16 sps:$4 sm:$0xff]   ;;  %v1333_v36 = vld [vmem:[%s1877_s1 + $0x1ec] ss:$16 sps:$4 sm:$0xff]  }
  0x25   :  { %867 = vmatprep.subr.bf16.mxu1 %v1237_v37  ;;  %v1336_v37 = vld [vmem:[%s1877_s1 + $0x3ec] ss:$16 sps:$4 sm:$0xff]  }
  0x27   :  { %825 = vmatpush2.bf16.msra.mxu0 %v1239_v38  ;;  %v1331_v38 = vld [vmem:[%s1877_s1 + $0x1e8] ss:$16 sps:$4 sm:$0xff]  }
  0x28   :  { %868 = vmatpush2.bf16.msra.mxu1 %v1240_v39  ;;  %826 = vmatprep.subr.bf16.mxu0 %v1241_v40  ;;  %v1334_v39 = vld [vmem:[%s1877_s1 + $0x3e8] ss:$16 sps:$4 sm:$0xff]   ;;  %v1339_v40 = vld [vmem:[%s1877_s1 + $0x1cc] ss:$16 sps:$4 sm:$0xff]  }
  0x29   :  { %869 = vmatprep.subr.bf16.mxu1 %v1243_v41  ;;  %v1342_v41 = vld [vmem:[%s1877_s1 + $0x3cc] ss:$16 sps:$4 sm:$0xff]  }
  0x2b   :  { %827 = vmatpush2.bf16.msra.mxu0 %v1245_v42  ;;  %v1337_v42 = vld [vmem:[%s1877_s1 + $0x1c8] ss:$16 sps:$4 sm:$0xff]  }
  0x2c   :  { %870 = vmatpush2.bf16.msra.mxu1 %v1246_v43  ;;  %828 = vmatprep.subr.bf16.mxu0 %v1247_v44  ;;  %v1340_v43 = vld [vmem:[%s1877_s1 + $0x3c8] ss:$16 sps:$4 sm:$0xff]   ;;  %v1345_v44 = vld [vmem:[%s1877_s1 + $0x1ac] ss:$16 sps:$4 sm:$0xff]  }
  0x2d   :  { %871 = vmatprep.subr.bf16.mxu1 %v1249_v45  ;;  %v1348_v45 = vld [vmem:[%s1877_s1 + $0x3ac] ss:$16 sps:$4 sm:$0xff]  }
  0x2f   :  { %829 = vmatpush2.bf16.msra.mxu0 %v1251_v46  ;;  %v1343_v46 = vld [vmem:[%s1877_s1 + $0x1a8] ss:$16 sps:$4 sm:$0xff]  }
  0x30   :  { %872 = vmatpush2.bf16.msra.mxu1 %v1252_v47  ;;  %830 = vmatprep.subr.bf16.mxu0 %v1253_v48  ;;  %v1346_v47 = vld [vmem:[%s1877_s1 + $0x3a8] ss:$16 sps:$4 sm:$0xff]   ;;  %v1351_v48 = vld [vmem:[%s1877_s1 + $0x18c] ss:$16 sps:$4 sm:$0xff]  }
  0x31   :  { %873 = vmatprep.subr.bf16.mxu1 %v1255_v50  ;;  %v1349_v50 = vld [vmem:[%s1877_s1 + $0x188] ss:$16 sps:$4 sm:$0xff]  }
  0x33   :  { %831 = vmatpush2.bf16.msra.mxu0 %v1257_v52  ;;  %v1357_v52 = vld [vmem:[%s1877_s1 + $0x16c] ss:$16 sps:$4 sm:$0xff]  }
  0x34   :  { %874 = vmatpush2.bf16.msra.mxu1 %v1258_v53  ;;  %832 = vmatprep.subr.bf16.mxu0 %v1259_v54  ;;  %v1360_v53 = vld [vmem:[%s1877_s1 + $0x36c] ss:$16 sps:$4 sm:$0xff]   ;;  %v1355_v54 = vld [vmem:[%s1877_s1 + $0x168] ss:$16 sps:$4 sm:$0xff]  }
  0x35   :  { %875 = vmatprep.subr.bf16.mxu1 %v1261_v55  ;;  %v1358_v55 = vld [vmem:[%s1877_s1 + $0x368] ss:$16 sps:$4 sm:$0xff]  }
  0x37   :  { %833 = vmatpush2.bf16.msra.mxu0 %v1263_v56  ;;  %v1363_v56 = vld [vmem:[%s1877_s1 + $0x14c] ss:$16 sps:$4 sm:$0xff]  }
  0x38   :  { %876 = vmatpush2.bf16.msra.mxu1 %v1264_v57  ;;  %834 = vmatprep.subr.bf16.mxu0 %v1265_v58  ;;  %v1366_v57 = vld [vmem:[%s1877_s1 + $0x34c] ss:$16 sps:$4 sm:$0xff]   ;;  %v1361_v58 = vld [vmem:[%s1877_s1 + $0x148] ss:$16 sps:$4 sm:$0xff]  }
  0x39   :  { %877 = vmatprep.subr.bf16.mxu1 %v1267_v59  ;;  %v1364_v59 = vld [vmem:[%s1877_s1 + $0x348] ss:$16 sps:$4 sm:$0xff]  }
  0x3b   :  { %835 = vmatpush2.bf16.msra.mxu0 %v1269_v60  ;;  %v1369_v60 = vld [vmem:[%s1877_s1 + $0x12c] ss:$16 sps:$4 sm:$0xff]  }
  0x3c   :  { %878 = vmatpush2.bf16.msra.mxu1 %v1270_v61  ;;  %836 = vmatprep.subr.bf16.mxu0 %v1271_v62  ;;  %v1372_v61 = vld [vmem:[%s1877_s1 + $0x32c] ss:$16 sps:$4 sm:$0xff]   ;;  %v1367_v62 = vld [vmem:[%s1877_s1 + $0x128] ss:$16 sps:$4 sm:$0xff]  }
  0x3d   :  { %879 = vmatprep.subr.bf16.mxu1 %v1273_v63  ;;  %v1370_v63 = vld [vmem:[%s1877_s1 + $0x328] ss:$16 sps:$4 sm:$0xff]  }
  0x3f   :  { %837 = vmatpush2.bf16.msra.mxu0 %v1275_v0  ;;  %v1375_v0 = vld [vmem:[%s1877_s1 + $0x10c] ss:$16 sps:$4 sm:$0xff]  }
  0x40   :  { %880 = vmatpush2.bf16.msra.mxu1 %v1276_v1  ;;  %892 = vmatprep.subr.bf16.mxu0 %v1285_v2  ;;  %v1378_v1 = vld [vmem:[%s1877_s1 + $0x30c] ss:$16 sps:$4 sm:$0xff]   ;;  %v1373_v2 = vld [vmem:[%s1877_s1 + $0x108] ss:$16 sps:$4 sm:$0xff]  }
  0x41   :  { %935 = vmatprep.subr.bf16.mxu1 %v1288_v3  ;;  %v1376_v3 = vld [vmem:[%s1877_s1 + $0x308] ss:$16 sps:$4 sm:$0xff]  }
  0x42   :  { %839 = vmatmul.mubr.bf16.vlgmr.msra.gmra.mxu0 %v1612_v4 }
  0x43   :  { %882 = vmatmul.mubr.bf16.vlgmr.msra.gmra.mxu1 %v1617_v5  ;;  %893 = vmatpush1.bf16.msra.mxu0 %v1283_v6  ;;  %v1379_v6 = vmov 0.0  }
  0x44   :  { %936 = vmatpush1.bf16.msra.mxu1 %v1286_v7  ;;  %894 = vmatprep.subr.bf16.mxu0 %v1291_v8  ;;  %991 = vst.msk [vmem:[%s1879_s3] sm:$0xff] %vm990_vm0, %v1379_v6  ;;  %992 = vst.msk [vmem:[%s1879_s3 + $0x8] sm:$0xff] %vm990_vm0, %v1379_v6 }
  0x45   :  { %937 = vmatprep.subr.bf16.mxu1 %v1294_v9  ;;  %924 = vmatprep.mubr.bf16.mxu0 %v1279_v49  ;;  %v1354_v49 = vld [vmem:[%s1877_s1 + $0x38c] ss:$16 sps:$4 sm:$0xff]   ;;  %993 = vst.msk [vmem:[%s1881_s4] sm:$0xff] %vm990_vm0, %v1379_v6  ;;  %994 = vst.msk [vmem:[%s1881_s4 + $0x8] sm:$0xff] %vm990_vm0, %v1379_v6 }
  0x46   :  { %967 = vmatprep.mubr.bf16.mxu1 %v1282_v51  ;;  %v1352_v51 = vld [vmem:[%s1877_s1 + $0x388] ss:$16 sps:$4 sm:$0xff]  }
  0x47   :  { %895 = vmatpush1.bf16.msra.mxu0 %v1289_v10 }
  0x48   :  { %938 = vmatpush1.bf16.msra.mxu1 %v1292_v11  ;;  %896 = vmatprep.subr.bf16.mxu0 %v1297_v12 }
  0x49   :  { %939 = vmatprep.subr.bf16.mxu1 %v1300_v13 }
  0x4b   :  { %897 = vmatpush1.bf16.msra.mxu0 %v1295_v14 }
  0x4c   :  { %940 = vmatpush1.bf16.msra.mxu1 %v1298_v15  ;;  %898 = vmatprep.subr.bf16.mxu0 %v1303_v16 }
  0x4d   :  { %941 = vmatprep.subr.bf16.mxu1 %v1306_v17 }
  0x4f   :  { %899 = vmatpush1.bf16.msra.mxu0 %v1301_v18 }
  0x50   :  { %942 = vmatpush1.bf16.msra.mxu1 %v1304_v19  ;;  %900 = vmatprep.subr.bf16.mxu0 %v1309_v20 }
  0x51   :  { %943 = vmatprep.subr.bf16.mxu1 %v1312_v21 }
  0x53   :  { %901 = vmatpush1.bf16.msra.mxu0 %v1307_v22 }
  0x54   :  { %944 = vmatpush1.bf16.msra.mxu1 %v1310_v23  ;;  %902 = vmatprep.subr.bf16.mxu0 %v1315_v24 }
  0x55   :  { %945 = vmatprep.subr.bf16.mxu1 %v1318_v25 }
  0x57   :  { %903 = vmatpush1.bf16.msra.mxu0 %v1313_v26 }
  0x58   :  { %946 = vmatpush1.bf16.msra.mxu1 %v1316_v27  ;;  %904 = vmatprep.subr.bf16.mxu0 %v1321_v28 }
  0x59   :  { %947 = vmatprep.subr.bf16.mxu1 %v1324_v29 }
  0x5b   :  { %905 = vmatpush1.bf16.msra.mxu0 %v1319_v30 }
  0x5c   :  { %948 = vmatpush1.bf16.msra.mxu1 %v1322_v31  ;;  %906 = vmatprep.subr.bf16.mxu0 %v1327_v32 }
  0x5d   :  { %949 = vmatprep.subr.bf16.mxu1 %v1330_v33 }
  0x5f   :  { %907 = vmatpush1.bf16.msra.mxu0 %v1325_v34 }
  0x60   :  { %950 = vmatpush1.bf16.msra.mxu1 %v1328_v35  ;;  %908 = vmatprep.subr.bf16.mxu0 %v1333_v36 }
  0x61   :  { %951 = vmatprep.subr.bf16.mxu1 %v1336_v37 }
  0x63   :  { %909 = vmatpush2.bf16.msra.mxu0 %v1331_v38 }
  0x64   :  { %952 = vmatpush2.bf16.msra.mxu1 %v1334_v39  ;;  %910 = vmatprep.subr.bf16.mxu0 %v1339_v40 }
  0x65   :  { %953 = vmatprep.subr.bf16.mxu1 %v1342_v41 }
  0x67   :  { %911 = vmatpush2.bf16.msra.mxu0 %v1337_v42 }
  0x68   :  { %954 = vmatpush2.bf16.msra.mxu1 %v1340_v43  ;;  %912 = vmatprep.subr.bf16.mxu0 %v1345_v44 }
  0x69   :  { %955 = vmatprep.subr.bf16.mxu1 %v1348_v45 }
  0x6b   :  { %913 = vmatpush2.bf16.msra.mxu0 %v1343_v46 }
  0x6c   :  { %956 = vmatpush2.bf16.msra.mxu1 %v1346_v47  ;;  %914 = vmatprep.subr.bf16.mxu0 %v1351_v48 }
  0x6d   :  { %957 = vmatprep.subr.bf16.mxu1 %v1354_v49  ;;  %v995_v49 = vld [vmem:[%s1879_s3] sm:$0xff] }
  0x6f   :  { %915 = vmatpush2.bf16.msra.mxu0 %v1349_v50 }
  0x70   :  { %958 = vmatpush2.bf16.msra.mxu1 %v1352_v51  ;;  %916 = vmatprep.subr.bf16.mxu0 %v1357_v52  ;;  %v1012_v51 = vld [vmem:[%s1881_s4] sm:$0xff] }
  0x71   :  { %959 = vmatprep.subr.bf16.mxu1 %v1360_v53 }
  0x73   :  { %917 = vmatpush2.bf16.msra.mxu0 %v1355_v54  ;;  %v996_v54 = vld [vmem:[%s1879_s3 + $0x8] sm:$0xff] }
  0x74   :  { %960 = vmatpush2.bf16.msra.mxu1 %v1358_v55  ;;  %918 = vmatprep.subr.bf16.mxu0 %v1363_v56 }
  0x75   :  { %961 = vmatprep.subr.bf16.mxu1 %v1366_v57  ;;  %v1013_v57 = vld [vmem:[%s1881_s4 + $0x8] sm:$0xff] }
  0x77   :  { %919 = vmatpush2.bf16.msra.mxu0 %v1361_v58 }
  0x78   :  { %962 = vmatpush2.bf16.msra.mxu1 %v1364_v59  ;;  %920 = vmatprep.subr.bf16.mxu0 %v1369_v60 }
  0x79   :  { %963 = vmatprep.subr.bf16.mxu1 %v1372_v61 }
  0x7b   :  { %921 = vmatpush2.bf16.msra.mxu0 %v1367_v62 }
  0x7c   :  { %964 = vmatpush2.bf16.msra.mxu1 %v1370_v63  ;;  %922 = vmatprep.subr.bf16.mxu0 %v1375_v0 }
  0x7d   :  { %965 = vmatprep.subr.bf16.mxu1 %v1378_v1 }
  0x7f   :  { %923 = vmatpush2.bf16.msra.mxu0 %v1373_v2 }
  0x80   :  { %966 = vmatpush2.bf16.msra.mxu1 %v1376_v3 }
  0x82   :  { %925 = vmatmul.mubr.bf16.vlgmr.msra.gmra.mxu0 %v1612_v4 }
  0x83   :  { %968 = vmatmul.mubr.bf16.vlgmr.msra.gmra.mxu1 %v1617_v5 }
 0x102   :  { %v840_v7 = vpop.f32.mrf.mxu0 }
 0x103   :  { %v883_v8 = vpop.f32.mrf.mxu1 }
 0x104   :  { %v884_v9 = vadd.f32 %v883_v8, %v840_v7  ;;  %v842_v10 = vpop.f32.mrf.mxu0 }
 0x105   :  { %v885_v11 = vpop.f32.mrf.mxu1 }
 0x106   :  { %978 = vst [vmem:[%s1880_s2] sm:$0xff] %v884_v9  ;;  %v886_v4 = vadd.f32 %v885_v11, %v842_v10  ;;  %v844_v5 = vpop.f32.mrf.mxu0  ;;  %v1014_v17 = vmul.f32 %v884_v9, %v884_v9 }
 0x107   :  { %v887_v12 = vpop.f32.mrf.mxu1 }
 0x108   :  { %979 = vst [vmem:[%s1880_s2 + $0x8] sm:$0xff] %v886_v4  ;;  %v888_v13 = vadd.f32 %v887_v12, %v844_v5  ;;  %v846_v14 = vpop.f32.mrf.mxu0  ;;  %v1015_v18 = vmul.f32 %v886_v4, %v886_v4  ;;  %v997_v22 = vadd.f32 %v886_v4, %v884_v9 }
 0x109   :  { %v889_v15 = vpop.f32.mrf.mxu1 }
 0x10a   :  { %982 = vst [vmem:[%s1880_s2 + $0x20] sm:$0xff] %v888_v13  ;;  %v890_v16 = vadd.f32 %v889_v15, %v846_v14  ;;  %v1022_v29 = vadd.f32 %v1015_v18, %v1014_v17  ;;  %v1018_v30 = vmul.f32 %v888_v13, %v888_v13 }
 0x10c   :  { %983 = vst [vmem:[%s1880_s2 + $0x28] sm:$0xff] %v890_v16  ;;  %v1019_v23 = vmul.f32 %v890_v16, %v890_v16  ;;  %v1002_v31 = vadd.f32 %v890_v16, %v888_v13 }
 0x10e   :  { %v1027_v40 = vadd.f32 %v1019_v23, %v1018_v30 }
 0x142   :  { %v926_v19 = vpop.f32.mrf.mxu0 }
 0x143   :  { %v969_v20 = vpop.f32.mrf.mxu1 }
 0x144   :  { %v970_v21 = vadd.f32 %v969_v20, %v926_v19  ;;  %v928_v24 = vpop.f32.mrf.mxu0 }
 0x145   :  { %v971_v25 = vpop.f32.mrf.mxu1 }
 0x146   :  { %980 = vst [vmem:[%s1880_s2 + $0x10] sm:$0xff] %v970_v21  ;;  %v972_v26 = vadd.f32 %v971_v25, %v928_v24  ;;  %v998_v27 = vadd.f32 %v997_v22, %v970_v21  ;;  %v1016_v28 = vmul.f32 %v970_v21, %v970_v21  ;;  %v930_v32 = vpop.f32.mrf.mxu0 }
 0x147   :  { %v973_v33 = vpop.f32.mrf.mxu1 }
 0x148   :  { %981 = vst [vmem:[%s1880_s2 + $0x18] sm:$0xff] %v972_v26  ;;  %v974_v34 = vadd.f32 %v973_v33, %v930_v32  ;;  %v999_v35 = vadd.f32 %v998_v27, %v972_v26  ;;  %v1017_v36 = vmul.f32 %v972_v26, %v972_v26  ;;  %v1023_v37 = vadd.f32 %v1022_v29, %v1016_v28  ;;  %v932_v38 = vpop.f32.mrf.mxu0 }
 0x149   :  { %v975_v39 = vpop.f32.mrf.mxu1 }
 0x14a   :  { %984 = vst [vmem:[%s1880_s2 + $0x30] sm:$0xff] %v974_v34  ;;  %v1020_v41 = vmul.f32 %v974_v34, %v974_v34  ;;  %v976_v42 = vadd.f32 %v975_v39, %v932_v38  ;;  %1000 = vadd.xlane.f32.xlu0 %v999_v35  ;;  %v1024_v43 = vadd.f32 %v1023_v37, %v1017_v36 }
 0x14b   :  { %v1003_v44 = vadd.f32 %v1002_v31, %v974_v34 }
 0x14c   :  { %985 = vst [vmem:[%s1880_s2 + $0x38] sm:$0xff] %v976_v42  ;;  %1025 = vadd.xlane.f32.xlu1 %v1024_v43  ;;  %v1021_v46 = vmul.f32 %v976_v42, %v976_v42  ;;  %v1028_v47 = vadd.f32 %v1027_v40, %v1020_v41 }
 0x14d   :  { %v1004_v45 = vadd.f32 %v1003_v44, %v976_v42 }
 0x14e   :  { %v1029_v48 = vadd.f32 %v1028_v47, %v1021_v46 }
 0x14f   :  { %1005 = vadd.xlane.f32.xlu0 %v1004_v45 }
 0x150   :  { %1030 = vadd.xlane.f32.xlu1 %v1029_v48 }
 0x1d3   :  { %v1001_v50 = vpop.xlane.xlu0 %1000 }
 0x1d4   :  { %v1007_v52 = vadd.f32 %v1001_v50, %v995_v49 }
 0x1d5   :  { %v1026_v53 = vpop.xlane.xlu1 %1025 }
 0x1d6   :  { %1010 = vst.msk [vmem:[%s1879_s3] sm:$0xff] %vm990_vm0, %v1007_v52  ;;  %v1032_v55 = vadd.f32 %v1026_v53, %v1012_v51 }
 0x1d8   :  { %v1006_v56 = vpop.xlane.xlu0 %1005  ;;  %1034 = vst.msk [vmem:[%s1881_s4] sm:$0xff] %vm990_vm0, %v1032_v55 }
 0x1d9   :  { %v1008_v58 = vadd.f32 %v1006_v56, %v996_v54  ;;  %v1031_v59 = vpop.xlane.xlu1 %1030 }
 0x1da   :  { %v1033_v60 = vadd.f32 %v1031_v59, %v1013_v57 }
 0x1db   :  { %1011 = vst.msk [vmem:[%s1879_s3 + $0x8] sm:$0xff] %vm990_vm0, %v1008_v58 }
 0x1dc   :  { %1035 = vst.msk [vmem:[%s1881_s4 + $0x8] sm:$0xff] %vm990_vm0, %v1033_v60 }

// kernel: _generator_forward.10
= control target key start
LH: loop header
LB: loop body
LE: loop exit
PB: predicated region body
PF: predicated region fallthrough
CT: control target
= control target key end

     0   :  { %v85_v0 = vmov 0   ;;  %s166_s2 = inlined_call_operand.vmem [shape: f32[16,1], index: 2, kind: input, shape index: {}]   ;;  %s167_s1 = inlined_call_operand.vmem [shape: f32[16,1], index: 1, kind: input, shape index: {}]   ;;  %s168_s0 = inlined_call_operand.vmem [shape: f32[16,512], index: 0, kind: input, shape index: {}]   ;;  %s169_s3 = inlined_call_operand.vmem [shape: f32[16,512], index: 3, kind: output, shape index: {}]  }
   0x1   :  { %84 = vset.pattern.permute.xlu1 %v85_v0  ;;  %83 = vset.pattern.permute.xlu0 %v85_v0  ;;  %v42_v1 = vld [vmem:[%s166_s2] sm:$0xff]  ;;  %v43_v3 = vld [vmem:[%s166_s2 + $0x8] sm:$0xff]  ;;  %v16_v7 = vld [vmem:[%s168_s0 + $0x10] sm:$0xff] }
   0x2   :  { %v22_v2 = vld [vmem:[%s167_s1] sm:$0xff]  ;;  %46 = vperm.xlu1 %84, %v42_v1   ;;  %v23_v4 = vld [vmem:[%s167_s1 + $0x8] sm:$0xff]  ;;  %v17_v8 = vld [vmem:[%s168_s0 + $0x18] sm:$0xff] }
   0x3   :  { %26 = vperm.xlu0 %83, %v22_v2   ;;  %v14_v5 = vld [vmem:[%s168_s0] sm:$0xff]  ;;  %v15_v6 = vld [vmem:[%s168_s0 + $0x8] sm:$0xff]  ;;  %v20_v21 = vld [vmem:[%s168_s0 + $0x30] sm:$0xff] }
   0x4   :  { %v18_v15 = vld [vmem:[%s168_s0 + $0x20] sm:$0xff]  ;;  %v19_v20 = vld [vmem:[%s168_s0 + $0x28] sm:$0xff]  ;;  %v21_v22 = vld [vmem:[%s168_s0 + $0x38] sm:$0xff] }
   0x6   :  { %51 = vperm.xlu1 %84, %v43_v3  }
   0x7   :  { %31 = vperm.xlu0 %83, %v23_v4  }
  0x7d   :  { %v47_v10 = vpop.permute.xlu1 %46 }
  0x7e   :  { %v27_v9 = vpop.permute.xlu0 %26 }
  0x7f   :  { %v34_v11 = vmul.f32 %v27_v9, %v14_v5  ;;  %v35_v12 = vmul.f32 %v27_v9, %v15_v6  ;;  %v36_v13 = vmul.f32 %v27_v9, %v16_v7  ;;  %v37_v14 = vmul.f32 %v27_v9, %v17_v8 }
  0x81   :  { %v54_v16 = vadd.f32 %v47_v10, %v34_v11  ;;  %v55_v17 = vadd.f32 %v47_v10, %v35_v12  ;;  %v56_v18 = vadd.f32 %v47_v10, %v36_v13  ;;  %v57_v19 = vadd.f32 %v47_v10, %v37_v14  ;;  %v52_v32 = vpop.permute.xlu1 %51 }
  0x82   :  { %v32_v23 = vpop.permute.xlu0 %31 }
  0x83   :  { %v62_v24 = vmax.f32 %v54_v16, 0.0  ;;  %v63_v25 = vmax.f32 %v55_v17, 0.0  ;;  %v64_v26 = vmax.f32 %v56_v18, 0.0  ;;  %v65_v27 = vmax.f32 %v57_v19, 0.0 }
  0x84   :  { %v38_v28 = vmul.f32 %v32_v23, %v18_v15  ;;  %v39_v29 = vmul.f32 %v32_v23, %v19_v20  ;;  %v40_v30 = vmul.f32 %v32_v23, %v20_v21  ;;  %v41_v31 = vmul.f32 %v32_v23, %v21_v22 }
  0x85   :  { %70 = vst [vmem:[%s169_s3] sm:$0xff] %v62_v24  ;;  %71 = vst [vmem:[%s169_s3 + $0x8] sm:$0xff] %v63_v25 }
  0x86   :  { %72 = vst [vmem:[%s169_s3 + $0x10] sm:$0xff] %v64_v26  ;;  %73 = vst [vmem:[%s169_s3 + $0x18] sm:$0xff] %v65_v27  ;;  %v58_v33 = vadd.f32 %v52_v32, %v38_v28  ;;  %v59_v34 = vadd.f32 %v52_v32, %v39_v29  ;;  %v60_v35 = vadd.f32 %v52_v32, %v40_v30 }
  0x87   :  { %v61_v36 = vadd.f32 %v52_v32, %v41_v31 }
  0x88   :  { %v66_v37 = vmax.f32 %v58_v33, 0.0  ;;  %v67_v38 = vmax.f32 %v59_v34, 0.0  ;;  %v68_v39 = vmax.f32 %v60_v35, 0.0 }
  0x89   :  { %v69_v40 = vmax.f32 %v61_v36, 0.0 }
  0x8a   :  { %74 = vst [vmem:[%s169_s3 + $0x20] sm:$0xff] %v66_v37  ;;  %75 = vst [vmem:[%s169_s3 + $0x28] sm:$0xff] %v67_v38 }
  0x8b   :  { %76 = vst [vmem:[%s169_s3 + $0x30] sm:$0xff] %v68_v39  ;;  %77 = vst [vmem:[%s169_s3 + $0x38] sm:$0xff] %v69_v40 }

// kernel: _generator_forward.11
= control target key start
LH: loop header
LB: loop body
LE: loop exit
PB: predicated region body
PF: predicated region fallthrough
CT: control target
= control target key end

     0   :  { %s1175_s15 = smov 0   ;;  %s1177_s16 = smov 0   ;;  %s1454_s0 = inlined_call_operand.vmem [shape: bf16[8,256], index: 0, kind: input, shape index: {}]   ;;  %s1455_s1 = inlined_call_operand.vmem [shape: bf16[256,2048], index: 1, kind: input, shape index: {}]   ;;  %s1456_s2 = inlined_call_operand.vmem [shape: f32[8,2048], index: 2, kind: output, shape index: {0}]   ;;  %s1457_s3 = inlined_call_operand.vmem [shape: f32[8,1], index: 3, kind: output, shape index: {1}]   ;;  %s1458_s4 = inlined_call_operand.vmem [shape: f32[8,1], index: 4, kind: output, shape index: {2}]  }
   0x1   :  { %s1179_s17 = smov 0  }
   0x2 LB: > { %s921_s18 = sadd.s32 4294967295, %s1147_s17   ;;  %s1192_s19 = sadd.s32 1, %s1147_s17   ;;  %s1147_s17 = sphi %s1179_s17, %s1461_s17   ;;  %s1143_s16 = sphi %s1177_s16, %s1460_s16   ;;  %s1139_s15 = sphi %s1175_s15, %s1459_s15  }
   0x3   : > { %s40_s20 = ssub.s32 %s1147_s17, %s1192_s19  ;;  %s43_s21 = sadd.s32 1, %s1143_s16 }
   0x4   : > { %p41_p0 = scmp.eq.s32.totalorder %s40_s20, 0  ;;  %p50_p1 = scmp.ne.s32.totalorder %s1143_s16, %s1139_s15 }
   0x5   : > { %p51_p2 = scmp.eq.s32.totalorder %s1147_s17, 0  ;;  %p924_p4 = scmp.ge.s32.totalorder %s1147_s17, 4 }
   0x6   : > { %s1201_s22 = scalar_select %p41_p0, %s1143_s16, %s43_s21  }
   0x7   : > { %p52_p3 = por %p51_p2, %p50_p1  ;;  %147 = sbr.rel (%p924_p4) target bundleno = 48 (0x30), region = 20 }
   0xc   : > { %150 = sbr.rel (!%p52_p3) target bundleno = 48 (0x30), region = 24  ;;  %s152_s23 = sand.u32 (%p52_p3), 1, %s1143_s16  }
   0xd   : > { %s1001_s24 = sshll.u32 (%p52_p3), %s1147_s17, 4  ;;  %s925_s25 = sshll.u32 (%p52_p3), %s152_s23, 9 }
   0xe   : > { %s1209_s28 = scalar_lea.vmem (%p52_p3), %s1455_s1, %s1001_s24  ;;  %s1214_s29 = scalar_lea.vmem (%p52_p3), [#allocation2], %s925_s25 }
   0xf   : > { %v170_v0 = vld [vmem:[%s1209_s28] sm:$0xff] (%p52_p3)  ;;  %v172_v1 = vld [vmem:[%s1209_s28 + $0x8] sm:$0xff] (%p52_p3) }
  0x10   : > { %v174_v2 = vld [vmem:[%s1209_s28 + $0x40] sm:$0xff] (%p52_p3)  ;;  %171 = vst [vmem:[%s1214_s29] sm:$0xff] (%p52_p3), %v170_v0  ;;  %173 = vst [vmem:[%s1214_s29 + $0x8] sm:$0xff] (%p52_p3), %v172_v1  ;;  %v176_v3 = vld [vmem:[%s1209_s28 + $0x48] sm:$0xff] (%p52_p3) }
  0x11   : > { %175 = vst [vmem:[%s1214_s29 + $0x10] sm:$0xff] %v174_v2  ;;  %v178_v4 = vld [vmem:[%s1209_s28 + $0x80] sm:$0xff]  ;;  %v180_v5 = vld [vmem:[%s1209_s28 + $0x88] sm:$0xff]  ;;  %177 = vst [vmem:[%s1214_s29 + $0x18] sm:$0xff] %v176_v3 }
  0x12   : > { %179 = vst [vmem:[%s1214_s29 + $0x20] sm:$0xff] %v178_v4  ;;  %181 = vst [vmem:[%s1214_s29 + $0x28] sm:$0xff] %v180_v5  ;;  %v182_v6 = vld [vmem:[%s1209_s28 + $0xc0] sm:$0xff]  ;;  %v184_v7 = vld [vmem:[%s1209_s28 + $0xc8] sm:$0xff] }
  0x13   : > { %v186_v8 = vld [vmem:[%s1209_s28 + $0x100] sm:$0xff]  ;;  %183 = vst [vmem:[%s1214_s29 + $0x30] sm:$0xff] %v182_v6  ;;  %185 = vst [vmem:[%s1214_s29 + $0x38] sm:$0xff] %v184_v7  ;;  %v188_v9 = vld [vmem:[%s1209_s28 + $0x108] sm:$0xff] }
  0x14   : > { %187 = vst [vmem:[%s1214_s29 + $0x40] sm:$0xff] %v186_v8  ;;  %v190_v10 = vld [vmem:[%s1209_s28 + $0x140] sm:$0xff]  ;;  %v192_v11 = vld [vmem:[%s1209_s28 + $0x148] sm:$0xff]  ;;  %189 = vst [vmem:[%s1214_s29 + $0x48] sm:$0xff] %v188_v9 }
  0x15   : > { %191 = vst [vmem:[%s1214_s29 + $0x50] sm:$0xff] %v190_v10  ;;  %193 = vst [vmem:[%s1214_s29 + $0x58] sm:$0xff] %v192_v11  ;;  %v194_v12 = vld [vmem:[%s1209_s28 + $0x180] sm:$0xff]  ;;  %v196_v13 = vld [vmem:[%s1209_s28 + $0x188] sm:$0xff] }
  0x16   : > { %v198_v14 = vld [vmem:[%s1209_s28 + $0x1c0] sm:$0xff]  ;;  %195 = vst [vmem:[%s1214_s29 + $0x60] sm:$0xff] %v194_v12  ;;  %197 = vst [vmem:[%s1214_s29 + $0x68] sm:$0xff] %v196_v13  ;;  %v200_v15 = vld [vmem:[%s1209_s28 + $0x1c8] sm:$0xff] }
  0x17   : > { %199 = vst [vmem:[%s1214_s29 + $0x70] sm:$0xff] %v198_v14  ;;  %v202_v16 = vld [vmem:[%s1209_s28 + $0x200] sm:$0xff]  ;;  %v204_v17 = vld [vmem:[%s1209_s28 + $0x208] sm:$0xff]  ;;  %201 = vst [vmem:[%s1214_s29 + $0x78] sm:$0xff] %v200_v15 }
  0x18   : > { %203 = vst [vmem:[%s1214_s29 + $0x80] sm:$0xff] %v202_v16  ;;  %205 = vst [vmem:[%s1214_s29 + $0x88] sm:$0xff] %v204_v17  ;;  %v206_v18 = vld [vmem:[%s1209_s28 + $0x240] sm:$0xff]  ;;  %v208_v19 = vld [vmem:[%s1209_s28 + $0x248] sm:$0xff] }
  0x19   : > { %v210_v20 = vld [vmem:[%s1209_s28 + $0x280] sm:$0xff]  ;;  %207 = vst [vmem:[%s1214_s29 + $0x90] sm:$0xff] %v206_v18  ;;  %209 = vst [vmem:[%s1214_s29 + $0x98] sm:$0xff] %v208_v19  ;;  %v212_v21 = vld [vmem:[%s1209_s28 + $0x288] sm:$0xff] }
  0x1a   : > { %211 = vst [vmem:[%s1214_s29 + $0xa0] sm:$0xff] %v210_v20  ;;  %v214_v22 = vld [vmem:[%s1209_s28 + $0x2c0] sm:$0xff]  ;;  %v216_v23 = vld [vmem:[%s1209_s28 + $0x2c8] sm:$0xff]  ;;  %213 = vst [vmem:[%s1214_s29 + $0xa8] sm:$0xff] %v212_v21 }
  0x1b   : > { %215 = vst [vmem:[%s1214_s29 + $0xb0] sm:$0xff] %v214_v22  ;;  %217 = vst [vmem:[%s1214_s29 + $0xb8] sm:$0xff] %v216_v23  ;;  %v218_v24 = vld [vmem:[%s1209_s28 + $0x300] sm:$0xff]  ;;  %v220_v25 = vld [vmem:[%s1209_s28 + $0x308] sm:$0xff] }
  0x1c   : > { %v222_v26 = vld [vmem:[%s1209_s28 + $0x340] sm:$0xff]  ;;  %219 = vst [vmem:[%s1214_s29 + $0xc0] sm:$0xff] %v218_v24  ;;  %221 = vst [vmem:[%s1214_s29 + $0xc8] sm:$0xff] %v220_v25  ;;  %v224_v27 = vld [vmem:[%s1209_s28 + $0x348] sm:$0xff] }
  0x1d   : > { %223 = vst [vmem:[%s1214_s29 + $0xd0] sm:$0xff] %v222_v26  ;;  %v226_v28 = vld [vmem:[%s1209_s28 + $0x380] sm:$0xff]  ;;  %v228_v29 = vld [vmem:[%s1209_s28 + $0x388] sm:$0xff]  ;;  %225 = vst [vmem:[%s1214_s29 + $0xd8] sm:$0xff] %v224_v27 }
  0x1e   : > { %227 = vst [vmem:[%s1214_s29 + $0xe0] sm:$0xff] %v226_v28  ;;  %229 = vst [vmem:[%s1214_s29 + $0xe8] sm:$0xff] %v228_v29  ;;  %v230_v30 = vld [vmem:[%s1209_s28 + $0x3c0] sm:$0xff]  ;;  %v232_v31 = vld [vmem:[%s1209_s28 + $0x3c8] sm:$0xff] }
  0x1f   : > { %v234_v32 = vld [vmem:[%s1209_s28 + $0x400] sm:$0xff]  ;;  %231 = vst [vmem:[%s1214_s29 + $0xf0] sm:$0xff] %v230_v30  ;;  %233 = vst [vmem:[%s1214_s29 + $0xf8] sm:$0xff] %v232_v31  ;;  %v236_v33 = vld [vmem:[%s1209_s28 + $0x408] sm:$0xff] }
  0x20   : > { %235 = vst [vmem:[%s1214_s29 + $0x100] sm:$0xff] %v234_v32  ;;  %v238_v34 = vld [vmem:[%s1209_s28 + $0x440] sm:$0xff]  ;;  %v240_v35 = vld [vmem:[%s1209_s28 + $0x448] sm:$0xff]  ;;  %237 = vst [vmem:[%s1214_s29 + $0x108] sm:$0xff] %v236_v33 }
  0x21   : > { %239 = vst [vmem:[%s1214_s29 + $0x110] sm:$0xff] %v238_v34  ;;  %241 = vst [vmem:[%s1214_s29 + $0x118] sm:$0xff] %v240_v35  ;;  %v242_v36 = vld [vmem:[%s1209_s28 + $0x480] sm:$0xff]  ;;  %v244_v37 = vld [vmem:[%s1209_s28 + $0x488] sm:$0xff] }
  0x22   : > { %v246_v38 = vld [vmem:[%s1209_s28 + $0x4c0] sm:$0xff]  ;;  %243 = vst [vmem:[%s1214_s29 + $0x120] sm:$0xff] %v242_v36  ;;  %245 = vst [vmem:[%s1214_s29 + $0x128] sm:$0xff] %v244_v37  ;;  %v248_v39 = vld [vmem:[%s1209_s28 + $0x4c8] sm:$0xff] }
  0x23   : > { %247 = vst [vmem:[%s1214_s29 + $0x130] sm:$0xff] %v246_v38  ;;  %v250_v40 = vld [vmem:[%s1209_s28 + $0x500] sm:$0xff]  ;;  %v252_v41 = vld [vmem:[%s1209_s28 + $0x508] sm:$0xff]  ;;  %249 = vst [vmem:[%s1214_s29 + $0x138] sm:$0xff] %v248_v39 }
  0x24   : > { %251 = vst [vmem:[%s1214_s29 + $0x140] sm:$0xff] %v250_v40  ;;  %253 = vst [vmem:[%s1214_s29 + $0x148] sm:$0xff] %v252_v41  ;;  %v254_v42 = vld [vmem:[%s1209_s28 + $0x540] sm:$0xff]  ;;  %v256_v43 = vld [vmem:[%s1209_s28 + $0x548] sm:$0xff] }
  0x25   : > { %v258_v44 = vld [vmem:[%s1209_s28 + $0x580] sm:$0xff]  ;;  %255 = vst [vmem:[%s1214_s29 + $0x150] sm:$0xff] %v254_v42  ;;  %257 = vst [vmem:[%s1214_s29 + $0x158] sm:$0xff] %v256_v43  ;;  %v260_v45 = vld [vmem:[%s1209_s28 + $0x588] sm:$0xff] }
  0x26   : > { %259 = vst [vmem:[%s1214_s29 + $0x160] sm:$0xff] %v258_v44  ;;  %v262_v46 = vld [vmem:[%s1209_s28 + $0x5c0] sm:$0xff]  ;;  %v264_v47 = vld [vmem:[%s1209_s28 + $0x5c8] sm:$0xff]  ;;  %261 = vst [vmem:[%s1214_s29 + $0x168] sm:$0xff] %v260_v45 }
  0x27   : > { %263 = vst [vmem:[%s1214_s29 + $0x170] sm:$0xff] %v262_v46  ;;  %265 = vst [vmem:[%s1214_s29 + $0x178] sm:$0xff] %v264_v47  ;;  %v266_v48 = vld [vmem:[%s1209_s28 + $0x600] sm:$0xff]  ;;  %v268_v49 = vld [vmem:[%s1209_s28 + $0x608] sm:$0xff] }
  0x28   : > { %v270_v50 = vld [vmem:[%s1209_s28 + $0x640] sm:$0xff]  ;;  %267 = vst [vmem:[%s1214_s29 + $0x180] sm:$0xff] %v266_v48  ;;  %269 = vst [vmem:[%s1214_s29 + $0x188] sm:$0xff] %v268_v49  ;;  %v272_v51 = vld [vmem:[%s1209_s28 + $0x648] sm:$0xff] }
  0x29   : > { %271 = vst [vmem:[%s1214_s29 + $0x190] sm:$0xff] %v270_v50  ;;  %v274_v52 = vld [vmem:[%s1209_s28 + $0x680] sm:$0xff]  ;;  %v276_v53 = vld [vmem:[%s1209_s28 + $0x688] sm:$0xff]  ;;  %273 = vst [vmem:[%s1214_s29 + $0x198] sm:$0xff] %v272_v51 }
  0x2a   : > { %275 = vst [vmem:[%s1214_s29 + $0x1a0] sm:$0xff] %v274_v52  ;;  %277 = vst [vmem:[%s1214_s29 + $0x1a8] sm:$0xff] %v276_v53  ;;  %v278_v54 = vld [vmem:[%s1209_s28 + $0x6c0] sm:$0xff]  ;;  %v280_v55 = vld [vmem:[%s1209_s28 + $0x6c8] sm:$0xff] }
  0x2b   : > { %v282_v56 = vld [vmem:[%s1209_s28 + $0x700] sm:$0xff]  ;;  %279 = vst [vmem:[%s1214_s29 + $0x1b0] sm:$0xff] %v278_v54  ;;  %281 = vst [vmem:[%s1214_s29 + $0x1b8] sm:$0xff] %v280_v55  ;;  %v284_v57 = vld [vmem:[%s1209_s28 + $0x708] sm:$0xff] }
  0x2c   : > { %283 = vst [vmem:[%s1214_s29 + $0x1c0] sm:$0xff] %v282_v56  ;;  %v286_v58 = vld [vmem:[%s1209_s28 + $0x740] sm:$0xff]  ;;  %v288_v59 = vld [vmem:[%s1209_s28 + $0x748] sm:$0xff]  ;;  %285 = vst [vmem:[%s1214_s29 + $0x1c8] sm:$0xff] %v284_v57 }
  0x2d   : > { %287 = vst [vmem:[%s1214_s29 + $0x1d0] sm:$0xff] %v286_v58  ;;  %289 = vst [vmem:[%s1214_s29 + $0x1d8] sm:$0xff] %v288_v59  ;;  %v290_v60 = vld [vmem:[%s1209_s28 + $0x780] sm:$0xff]  ;;  %v292_v61 = vld [vmem:[%s1209_s28 + $0x788] sm:$0xff] }
  0x2e   : > { %v294_v62 = vld [vmem:[%s1209_s28 + $0x7c0] sm:$0xff]  ;;  %291 = vst [vmem:[%s1214_s29 + $0x1e0] sm:$0xff] %v290_v60  ;;  %293 = vst [vmem:[%s1214_s29 + $0x1e8] sm:$0xff] %v292_v61  ;;  %v296_v63 = vld [vmem:[%s1209_s28 + $0x7c8] sm:$0xff] }
  0x2f   : > { %295 = vst [vmem:[%s1214_s29 + $0x1f0] sm:$0xff] %v294_v62  ;;  %297 = vst [vmem:[%s1214_s29 + $0x1f8] sm:$0xff] %v296_v63 }
  0x30 PF: > { %p928_p5 = scmp.ge.s32.totalorder %s1147_s17, 1  ;;  %p302_p6 = scmp.lt.s32.totalorder %s1147_s17, 5 }
  0x32   : > { %p303_p7 = pnand %p928_p5, %p302_p6 }
  0x33   : > { %s309_s30 = sand.u32 (!%p303_p7), 1, %s1139_s15   ;;  %s930_s9 = sshll.u32 (!%p303_p7), %s921_s18, 2 }
  0x34   : > { %306 = sbr.rel (%p303_p7) target bundleno = 476 (0x1dc), region = 47  ;;  %s929_s7 = sshll.u32 (!%p303_p7), %s309_s30, 9 }
  0x35   : > { %s1351_s8 = scalar_lea.vmem (!%p303_p7), [#allocation2], %s929_s7  ;;  %p336_p8 = scmp.lt.s32.totalorder (!%p303_p7), %s930_s9, 15 }
  0x36   : > { %p998_p9 = scmp.ne.s32.totalorder (!%p303_p7), %s921_s18, 0 }
  0x39   : > { %v1347_v0 = vld [vmem:[%s1454_s0] sm:$0xff]  ;;  %v1029_v3 = vld [vmem:[%s1351_s8 + $0xec] ss:$16 sps:$4 sm:$0xff]   ;;  %v1032_v5 = vld [vmem:[%s1351_s8 + $0xe8] ss:$16 sps:$4 sm:$0xff]   ;;  %s1463_s9 = smov (!%p336_p8, %s930_s9), 15 }
  0x3a   : > { %v933_v1 = vcombine.high %v1347_v0, %v1347_v0  ;;  %v1027_v2 = vld [vmem:[%s1351_s8 + $0xe4] ss:$16 sps:$4 sm:$0xff]   ;;  %v1031_v4 = vld [vmem:[%s1351_s8 + $0xe0] ss:$16 sps:$4 sm:$0xff]   ;;  %774 = vmatprep.subr.bf16.mxu1 %v1029_v3  ;;  %v1035_v7 = vld [vmem:[%s1351_s8 + $0xcc] ss:$16 sps:$4 sm:$0xff]   ;;  %v932_v3 = vcombine.low %v1347_v0, %v1347_v0 }
  0x3b   : > { %733 = vmatprep.subr.bf16.mxu0 %v1027_v2  ;;  %v1033_v6 = vld [vmem:[%s1351_s8 + $0xc4] ss:$16 sps:$4 sm:$0xff]   ;;  %775 = vmatpush1.bf16.msra.mxu1 %v1032_v5  ;;  %v1037_v8 = vld [vmem:[%s1351_s8 + $0xc0] ss:$16 sps:$4 sm:$0xff]   ;;  %v1038_v9 = vld [vmem:[%s1351_s8 + $0xc8] ss:$16 sps:$4 sm:$0xff]  }
  0x3c   : > { %765 = vmatprep.mubr.bf16.mxu0 %v933_v1  ;;  %806 = vmatprep.mubr.bf16.mxu1 %v933_v1  ;;  %v1039_v10 = vld [vmem:[%s1351_s8 + $0xa4] ss:$16 sps:$4 sm:$0xff]   ;;  %v1041_v11 = vld [vmem:[%s1351_s8 + $0xac] ss:$16 sps:$4 sm:$0xff]   ;;  %v1043_v12 = vld [vmem:[%s1351_s8 + $0xa0] ss:$16 sps:$4 sm:$0xff]  }
  0x3d   : > { %734 = vmatpush1.bf16.msra.mxu0 %v1031_v4  ;;  %776 = vmatprep.subr.bf16.mxu1 %v1035_v7  ;;  %v1044_v13 = vld [vmem:[%s1351_s8 + $0xa8] ss:$16 sps:$4 sm:$0xff]   ;;  %v1045_v14 = vld [vmem:[%s1351_s8 + $0x84] ss:$16 sps:$4 sm:$0xff]   ;;  %v1047_v15 = vld [vmem:[%s1351_s8 + $0x8c] ss:$16 sps:$4 sm:$0xff]  }
  0x3e   : > { %735 = vmatprep.subr.bf16.mxu0 %v1033_v6  ;;  %v1049_v16 = vld [vmem:[%s1351_s8 + $0x80] ss:$16 sps:$4 sm:$0xff]   ;;  %v1050_v17 = vld [vmem:[%s1351_s8 + $0x88] ss:$16 sps:$4 sm:$0xff]   ;;  %v1051_v18 = vld [vmem:[%s1351_s8 + $0x64] ss:$16 sps:$4 sm:$0xff]  }
  0x3f   : > { %777 = vmatpush1.bf16.msra.mxu1 %v1038_v9  ;;  %v1053_v19 = vld [vmem:[%s1351_s8 + $0x6c] ss:$16 sps:$4 sm:$0xff]   ;;  %v1055_v20 = vld [vmem:[%s1351_s8 + $0x60] ss:$16 sps:$4 sm:$0xff]   ;;  %v1056_v21 = vld [vmem:[%s1351_s8 + $0x68] ss:$16 sps:$4 sm:$0xff]  }
  0x40   : > { %778 = vmatprep.subr.bf16.mxu1 %v1041_v11  ;;  %v1057_v22 = vld [vmem:[%s1351_s8 + $0x44] ss:$16 sps:$4 sm:$0xff]   ;;  %v1059_v23 = vld [vmem:[%s1351_s8 + $0x4c] ss:$16 sps:$4 sm:$0xff]   ;;  %v1061_v24 = vld [vmem:[%s1351_s8 + $0x40] ss:$16 sps:$4 sm:$0xff]  }
  0x41   : > { %736 = vmatpush1.bf16.msra.mxu0 %v1037_v8  ;;  %v1062_v25 = vld [vmem:[%s1351_s8 + $0x48] ss:$16 sps:$4 sm:$0xff]   ;;  %v1063_v26 = vld [vmem:[%s1351_s8 + $0x24] ss:$16 sps:$4 sm:$0xff]   ;;  %v1065_v27 = vld [vmem:[%s1351_s8 + $0x2c] ss:$16 sps:$4 sm:$0xff]  }
  0x42   : > { %737 = vmatprep.subr.bf16.mxu0 %v1039_v10  ;;  %v1067_v28 = vld [vmem:[%s1351_s8 + $0x20] ss:$16 sps:$4 sm:$0xff]   ;;  %v1068_v29 = vld [vmem:[%s1351_s8 + $0x28] ss:$16 sps:$4 sm:$0xff]   ;;  %v1069_v30 = vld [vmem:[%s1351_s8 + $0x4] ss:$16 sps:$4 sm:$0xff]  }
  0x43   : > { %779 = vmatpush1.bf16.msra.mxu1 %v1044_v13  ;;  %v1071_v31 = vld [vmem:[%s1351_s8 + $0xc] ss:$16 sps:$4 sm:$0xff]   ;;  %v1073_v32 = vld [vmem:[%s1351_s8] ss:$16 sps:$4 sm:$0xff]   ;;  %v1074_v33 = vld [vmem:[%s1351_s8 + $0x8] ss:$16 sps:$4 sm:$0xff]  }
  0x44   : > { %780 = vmatprep.subr.bf16.mxu1 %v1047_v15  ;;  %v1075_v34 = vld [vmem:[%s1351_s8 + $0x1e4] ss:$16 sps:$4 sm:$0xff]   ;;  %v1077_v35 = vld [vmem:[%s1351_s8 + $0x1ec] ss:$16 sps:$4 sm:$0xff]   ;;  %v1079_v36 = vld [vmem:[%s1351_s8 + $0x1e0] ss:$16 sps:$4 sm:$0xff]  }
  0x45   : > { %738 = vmatpush1.bf16.msra.mxu0 %v1043_v12  ;;  %v1080_v37 = vld [vmem:[%s1351_s8 + $0x1e8] ss:$16 sps:$4 sm:$0xff]   ;;  %v1081_v38 = vld [vmem:[%s1351_s8 + $0x1c4] ss:$16 sps:$4 sm:$0xff]   ;;  %v1083_v39 = vld [vmem:[%s1351_s8 + $0x1cc] ss:$16 sps:$4 sm:$0xff]  }
  0x46   : > { %739 = vmatprep.subr.bf16.mxu0 %v1045_v14  ;;  %v1085_v40 = vld [vmem:[%s1351_s8 + $0x1c0] ss:$16 sps:$4 sm:$0xff]   ;;  %v1086_v41 = vld [vmem:[%s1351_s8 + $0x1c8] ss:$16 sps:$4 sm:$0xff]   ;;  %v1087_v42 = vld [vmem:[%s1351_s8 + $0x1a4] ss:$16 sps:$4 sm:$0xff]  }
  0x47   : > { %781 = vmatpush1.bf16.msra.mxu1 %v1050_v17  ;;  %v1089_v43 = vld [vmem:[%s1351_s8 + $0x1ac] ss:$16 sps:$4 sm:$0xff]   ;;  %v1091_v44 = vld [vmem:[%s1351_s8 + $0x1a0] ss:$16 sps:$4 sm:$0xff]   ;;  %v1092_v45 = vld [vmem:[%s1351_s8 + $0x1a8] ss:$16 sps:$4 sm:$0xff]  }
  0x48   : > { %782 = vmatprep.subr.bf16.mxu1 %v1053_v19  ;;  %v1093_v46 = vld [vmem:[%s1351_s8 + $0x184] ss:$16 sps:$4 sm:$0xff]   ;;  %v1095_v47 = vld [vmem:[%s1351_s8 + $0x18c] ss:$16 sps:$4 sm:$0xff]   ;;  %v1097_v48 = vld [vmem:[%s1351_s8 + $0x180] ss:$16 sps:$4 sm:$0xff]  }
  0x49   : > { %740 = vmatpush1.bf16.msra.mxu0 %v1049_v16  ;;  %v1098_v49 = vld [vmem:[%s1351_s8 + $0x188] ss:$16 sps:$4 sm:$0xff]   ;;  %v1099_v50 = vld [vmem:[%s1351_s8 + $0x164] ss:$16 sps:$4 sm:$0xff]   ;;  %v1101_v51 = vld [vmem:[%s1351_s8 + $0x16c] ss:$16 sps:$4 sm:$0xff]  }
  0x4a   : > { %741 = vmatprep.subr.bf16.mxu0 %v1051_v18  ;;  %v1103_v52 = vld [vmem:[%s1351_s8 + $0x160] ss:$16 sps:$4 sm:$0xff]   ;;  %v1104_v53 = vld [vmem:[%s1351_s8 + $0x168] ss:$16 sps:$4 sm:$0xff]   ;;  %v1105_v54 = vld [vmem:[%s1351_s8 + $0x144] ss:$16 sps:$4 sm:$0xff]  }
  0x4b   : > { %783 = vmatpush1.bf16.msra.mxu1 %v1056_v21  ;;  %v1107_v55 = vld [vmem:[%s1351_s8 + $0x14c] ss:$16 sps:$4 sm:$0xff]   ;;  %v1109_v56 = vld [vmem:[%s1351_s8 + $0x140] ss:$16 sps:$4 sm:$0xff]   ;;  %v1110_v57 = vld [vmem:[%s1351_s8 + $0x148] ss:$16 sps:$4 sm:$0xff]  }
  0x4c   : > { %784 = vmatprep.subr.bf16.mxu1 %v1059_v23  ;;  %v1111_v58 = vld [vmem:[%s1351_s8 + $0x124] ss:$16 sps:$4 sm:$0xff]   ;;  %v1113_v59 = vld [vmem:[%s1351_s8 + $0x12c] ss:$16 sps:$4 sm:$0xff]   ;;  %v1115_v60 = vld [vmem:[%s1351_s8 + $0x120] ss:$16 sps:$4 sm:$0xff]  }
  0x4d   : > { %742 = vmatpush1.bf16.msra.mxu0 %v1055_v20  ;;  %v1116_v61 = vld [vmem:[%s1351_s8 + $0x128] ss:$16 sps:$4 sm:$0xff]   ;;  %v1117_v62 = vld [vmem:[%s1351_s8 + $0x104] ss:$16 sps:$4 sm:$0xff]   ;;  %v1119_v63 = vld [vmem:[%s1351_s8 + $0x10c] ss:$16 sps:$4 sm:$0xff]  }
  0x4e   : > { %743 = vmatprep.subr.bf16.mxu0 %v1057_v22  ;;  %v1121_v1 = vld [vmem:[%s1351_s8 + $0x100] ss:$16 sps:$4 sm:$0xff]   ;;  %v1122_v2 = vld [vmem:[%s1351_s8 + $0x108] ss:$16 sps:$4 sm:$0xff]   ;;  %s931_s10 = sshll.u32 %s1463_s9, 3 }
  0x4f   : > { %785 = vmatpush1.bf16.msra.mxu1 %v1062_v25  ;;  %s339_s13 = scalar_lea.vmem %s1456_s2, %s931_s10 }
  0x50   : > { %786 = vmatprep.subr.bf16.mxu1 %v1065_v27 }
  0x51   : > { %744 = vmatpush1.bf16.msra.mxu0 %v1061_v24 }
  0x52   : > { %745 = vmatprep.subr.bf16.mxu0 %v1063_v26 }
  0x53   : > { %787 = vmatpush1.bf16.msra.mxu1 %v1068_v29 }
  0x54   : > { %788 = vmatprep.subr.bf16.mxu1 %v1071_v31 }
  0x55   : > { %746 = vmatpush1.bf16.msra.mxu0 %v1067_v28 }
  0x56   : > { %747 = vmatprep.subr.bf16.mxu0 %v1069_v30 }
  0x57   : > { %789 = vmatpush1.bf16.msra.mxu1 %v1074_v33 }
  0x58   : > { %790 = vmatprep.subr.bf16.mxu1 %v1077_v35 }
  0x59   : > { %748 = vmatpush1.bf16.msra.mxu0 %v1073_v32 }
  0x5a   : > { %749 = vmatprep.subr.bf16.mxu0 %v1075_v34 }
  0x5b   : > { %791 = vmatpush2.bf16.msra.mxu1 %v1080_v37 }
  0x5c   : > { %792 = vmatprep.subr.bf16.mxu1 %v1083_v39 }
  0x5d   : > { %750 = vmatpush2.bf16.msra.mxu0 %v1079_v36 }
  0x5e   : > { %751 = vmatprep.subr.bf16.mxu0 %v1081_v38 }
  0x5f   : > { %793 = vmatpush2.bf16.msra.mxu1 %v1086_v41 }
  0x60   : > { %794 = vmatprep.subr.bf16.mxu1 %v1089_v43 }
  0x61   : > { %752 = vmatpush2.bf16.msra.mxu0 %v1085_v40 }
  0x62   : > { %753 = vmatprep.subr.bf16.mxu0 %v1087_v42 }
  0x63   : > { %795 = vmatpush2.bf16.msra.mxu1 %v1092_v45 }
  0x64   : > { %796 = vmatprep.subr.bf16.mxu1 %v1095_v47 }
  0x65   : > { %754 = vmatpush2.bf16.msra.mxu0 %v1091_v44 }
  0x66   : > { %755 = vmatprep.subr.bf16.mxu0 %v1093_v46 }
  0x67   : > { %797 = vmatpush2.bf16.msra.mxu1 %v1098_v49 }
  0x68   : > { %798 = vmatprep.subr.bf16.mxu1 %v1101_v51 }
  0x69   : > { %756 = vmatpush2.bf16.msra.mxu0 %v1097_v48 }
  0x6a   : > { %757 = vmatprep.subr.bf16.mxu0 %v1099_v50 }
  0x6b   : > { %799 = vmatpush2.bf16.msra.mxu1 %v1104_v53 }
  0x6c   : > { %800 = vmatprep.subr.bf16.mxu1 %v1107_v55 }
  0x6d   : > { %758 = vmatpush2.bf16.msra.mxu0 %v1103_v52 }
  0x6e   : > { %759 = vmatprep.subr.bf16.mxu0 %v1105_v54 }
  0x6f   : > { %801 = vmatpush2.bf16.msra.mxu1 %v1110_v57 }
  0x70   : > { %802 = vmatprep.subr.bf16.mxu1 %v1113_v59 }
  0x71   : > { %760 = vmatpush2.bf16.msra.mxu0 %v1109_v56 }
  0x72   : > { %761 = vmatprep.subr.bf16.mxu0 %v1111_v58 }
  0x73   : > { %803 = vmatpush2.bf16.msra.mxu1 %v1116_v61 }
  0x74   : > { %804 = vmatprep.subr.bf16.mxu1 %v1119_v63 }
  0x75   : > { %762 = vmatpush2.bf16.msra.mxu0 %v1115_v60 }
  0x76   : > { %763 = vmatprep.subr.bf16.mxu0 %v1117_v62 }
  0x77   : > { %805 = vmatpush2.bf16.msra.mxu1 %v1122_v2 }
  0x79   : > { %764 = vmatpush2.bf16.msra.mxu0 %v1121_v1 }
  0x7a   : > { %807 = vmatmul.mubr.bf16.vlgmr.msra.gmra.mxu1 %v932_v3 }
  0x7c   : > { %766 = vmatmul.mubr.bf16.vlgmr.msra.gmra.mxu0 %v932_v3 }
 0x13a   : > { %v808_v5 = vpop.f32.mrf.mxu1 }
 0x13b   : > { %817 = vst [vmem:[%s339_s13 + $0x10] sm:$0xff] %v808_v5 }
 0x13c   : > { %v767_v4 = vpop.f32.mrf.mxu0  ;;  %v810_v7 = vpop.f32.mrf.mxu1 }
 0x13d   : > { %815 = vst [vmem:[%s339_s13] sm:$0xff] %v767_v4  ;;  %818 = vst [vmem:[%s339_s13 + $0x18] sm:$0xff] %v810_v7 }
 0x13e   : > { %v769_v6 = vpop.f32.mrf.mxu0  ;;  %v812_v8 = vpop.f32.mrf.mxu1  ;;  %822 = sbr.rel (%p998_p9) target bundleno = 325 (0x145), region = 55 }
 0x13f   : > { %816 = vst [vmem:[%s339_s13 + $0x8] sm:$0xff] %v769_v6 }
 0x140   : > { %v771_v0 = vpop.f32.mrf.mxu0  ;;  %v813_v10 = vpop.f32.mrf.mxu1 }
 0x142   : > { %v772_v9 = vpop.f32.mrf.mxu0 }
 0x143   : > { %vm823_vm0 = vcmask 7168   ;;  %v1149_v11 = vmov 0.0  }
 0x144   : > { %824 = vst.msk [vmem:[%s1457_s3] sm:$0xff] %vm823_vm0, %v1149_v11  ;;  %825 = vst.msk [vmem:[%s1458_s4] sm:$0xff] %vm823_vm0, %v1149_v11 }
 0x145 PF: > { %v827_v12 = vadd.f32 %v769_v6, %v767_v4  ;;  %v836_v13 = vmul.f32 %v767_v4, %v767_v4  ;;  %v837_v14 = vmul.f32 %v769_v6, %v769_v6  ;;  %v838_v15 = vmul.f32 %v808_v5, %v808_v5 }
 0x146   : > { %v839_v17 = vmul.f32 %v810_v7, %v810_v7  ;;  %vm833_vm1 = vcmask 7168  }
 0x147   : > { %v828_v16 = vadd.f32 %v827_v12, %v808_v5  ;;  %v840_v18 = vadd.f32 %v837_v14, %v836_v13 }
 0x149   : > { %v829_v19 = vadd.f32 %v828_v16, %v810_v7  ;;  %v841_v20 = vadd.f32 %v840_v18, %v838_v15 }
 0x14b   : > { %830 = vadd.xlane.f32.xlu0 %v829_v19  ;;  %v842_v21 = vadd.f32 %v841_v20, %v839_v17  ;;  %v826_v22 = vld [vmem:[%s1457_s3] sm:$0xff] }
 0x14c   : > { %v835_v25 = vld [vmem:[%s1458_s4] sm:$0xff] }
 0x14f   : > { %843 = vadd.xlane.f32.xlu0 %v842_v21 }
 0x1d4   : > { %v831_v23 = vpop.xlane.xlu0 %830 }
 0x1d5   : > { %v832_v24 = vadd.f32 %v831_v23, %v826_v22 }
 0x1d7   : > { %834 = vst.msk [vmem:[%s1457_s3] sm:$0xff] %vm833_vm1, %v832_v24 }
 0x1d8   : > { %v844_v26 = vpop.xlane.xlu0 %843 }
 0x1d9   : > { %v845_v27 = vadd.f32 %v844_v26, %v835_v25 }
 0x1db   : > { %846 = vst.msk [vmem:[%s1458_s4] sm:$0xff] %vm833_vm1, %v845_v27 }
 0x1dc PF: > { %p12_p10 = scmp.ge.s32.totalorder %s1192_s19, 6   ;;  %s1459_s15 = smov %s1143_s16 }
 0x1dd   : > { %s1460_s16 = smov %s1201_s22  ;;  %s1461_s17 = smov %s1192_s19 }
 0x1de   :  { %14 = sbr.rel (!%p12_p10) target bundleno = 2 (0x2), region = 106 }

// kernel: _generator_forward.12
= control target key start
LH: loop header
LB: loop body
LE: loop exit
PB: predicated region body
PF: predicated region fallthrough
CT: control target
= control target key end

     0   :  { %s312_s12 = smov 0   ;;  %s335_s0 = inlined_call_operand.vmem [shape: f32[8,2048], index: 0, kind: input, shape index: {}]   ;;  %s336_s1 = inlined_call_operand.vmem [shape: f32[8,1], index: 1, kind: input, shape index: {}]   ;;  %s337_s2 = inlined_call_operand.vmem [shape: f32[8,1], index: 2, kind: input, shape index: {}]   ;;  %s338_s3 = inlined_call_operand.vmem [shape: f32[8,2048], index: 3, kind: output, shape index: {}]  }
   0x1 LB: > { %s262_s13 = sadd.s32 4294967295, %s289_s12   ;;  %p266_p0 = scmp.ge.s32.totalorder %s289_s12, 1  ;;  %s289_s12 = sphi %s312_s12, %s13_s12  }
   0x2   : > { %p138_p1 = scmp.lt.s32.totalorder %s289_s12, 5 }
   0x4   : > { %p139_p2 = pnand %p266_p0, %p138_p1 }
   0x5   : > { %s267_s18 = sshll.u32 (!%p139_p2), %s262_s13, 2 }
   0x6   : > { %142 = sbr.rel (%p139_p2) target bundleno = 147 (0x93), region = 32  ;;  %p163_p3 = scmp.lt.s32.totalorder (!%p139_p2), %s267_s18, 15 }
   0xb   : > { %v178_v0 = vld [vmem:[%s336_s1] sm:$0xff]  ;;  %v291_v1 = vmov 0   ;;  %s340_s18 = smov (!%p163_p3, %s267_s18), 15 }
   0xc   : > { %282 = vset.pattern.permute.xlu0 %v291_v1  ;;  %v188_v2 = vld [vmem:[%s337_s2] sm:$0xff]  ;;  %s268_s19 = sshll.u32 %s340_s18, 3 }
   0xd   : > { %181 = vperm.xlu0 %282, %v178_v0   ;;  %s166_s22 = scalar_lea.vmem %s335_s0, %s268_s19  ;;  %s172_s25 = scalar_lea.vmem %s338_s3, %s268_s19 }
   0xe   : > { %v174_v3 = vld [vmem:[%s166_s22] sm:$0xff]  ;;  %v175_v5 = vld [vmem:[%s166_s22 + $0x8] sm:$0xff]  ;;  %v176_v6 = vld [vmem:[%s166_s22 + $0x10] sm:$0xff] }
   0xf   : > { %v177_v7 = vld [vmem:[%s166_s22 + $0x18] sm:$0xff] }
  0x11   : > { %191 = vperm.xlu0 %282, %v188_v2  }
  0x88   : > { %v182_v4 = vpop.permute.xlu0 %181 }
  0x89   : > { %v184_v8 = vmul.f32 %v182_v4, %v174_v3  ;;  %v185_v9 = vmul.f32 %v182_v4, %v175_v5  ;;  %v186_v10 = vmul.f32 %v182_v4, %v176_v6  ;;  %v187_v11 = vmul.f32 %v182_v4, %v177_v7 }
  0x8c   : > { %v192_v12 = vpop.permute.xlu0 %191 }
  0x8d   : > { %v194_v13 = vadd.f32 %v192_v12, %v184_v8  ;;  %v195_v14 = vadd.f32 %v192_v12, %v185_v9  ;;  %v196_v15 = vadd.f32 %v192_v12, %v186_v10  ;;  %v197_v16 = vadd.f32 %v192_v12, %v187_v11 }
  0x8f   : > { %v198_v17 = vmax.f32 %v194_v13, 0.0  ;;  %v199_v18 = vmax.f32 %v195_v14, 0.0  ;;  %v200_v19 = vmax.f32 %v196_v15, 0.0  ;;  %v201_v20 = vmax.f32 %v197_v16, 0.0 }
  0x91   : > { %202 = vst [vmem:[%s172_s25] sm:$0xff] %v198_v17  ;;  %203 = vst [vmem:[%s172_s25 + $0x8] sm:$0xff] %v199_v18 }
  0x92   : > { %204 = vst [vmem:[%s172_s25 + $0x10] sm:$0xff] %v200_v19  ;;  %205 = vst [vmem:[%s172_s25 + $0x18] sm:$0xff] %v201_v20 }
  0x93 PF: > { %s13_s12 = sadd.s32 1, %s289_s12  }
  0x94   : > { %p10_p4 = scmp.ge.s32.totalorder %s13_s12, 6  }
  0x96   :  { %12 = sbr.rel (!%p10_p4) target bundleno = 1 (0x1), region = 62 }

// kernel: _generator_forward.13
= control target key start
LH: loop header
LB: loop body
LE: loop exit
PB: predicated region body
PF: predicated region fallthrough
CT: control target
= control target key end

     0   :  { %s764_s9 = smov 0   ;;  %s766_s10 = smov 0   ;;  %s921_s0 = inlined_call_operand.vmem [shape: bf16[1,128], index: 0, kind: input, shape index: {}]   ;;  %s922_s1 = inlined_call_operand.vmem [shape: bf16[128,6656], index: 1, kind: input, shape index: {}]   ;;  %s923_s2 = inlined_call_operand.vmem [shape: f32[1,6656], index: 2, kind: output, shape index: {}]  }
   0x1   :  { %s768_s11 = smov 0  }
   0x2 LB: > { %s596_s12 = sadd.s32 4294967295, %s745_s11   ;;  %s781_s13 = sadd.s32 1, %s745_s11   ;;  %s745_s11 = sphi %s768_s11, %s926_s11   ;;  %s741_s10 = sphi %s766_s10, %s925_s10   ;;  %s737_s9 = sphi %s764_s9, %s924_s9  }
   0x3   : > { %s37_s14 = ssub.s32 %s745_s11, %s781_s13  ;;  %s40_s15 = sadd.s32 1, %s741_s10 }
   0x4   : > { %p38_p0 = scmp.eq.s32.totalorder %s37_s14, 0  ;;  %p47_p1 = scmp.ne.s32.totalorder %s741_s10, %s737_s9 }
   0x5   : > { %p48_p2 = scmp.eq.s32.totalorder %s745_s11, 0  ;;  %p599_p4 = scmp.ge.s32.totalorder %s745_s11, 13 }
   0x6   : > { %s790_s16 = scalar_select %p38_p0, %s741_s10, %s40_s15  }
   0x7   : > { %p49_p3 = por %p48_p2, %p47_p1  ;;  %102 = sbr.rel (%p599_p4) target bundleno = 32 (0x20), region = 20 }
   0xc   : > { %105 = sbr.rel (!%p49_p3) target bundleno = 32 (0x20), region = 24  ;;  %s107_s17 = sand.u32 (%p49_p3), 1, %s741_s10  }
   0xd   : > { %s640_s18 = sshll.u32 (%p49_p3), %s745_s11, 4  ;;  %s600_s19 = sshll.u32 (%p49_p3), %s107_s17, 8 }
   0xe   : > { %s798_s22 = scalar_lea.vmem (%p49_p3), %s922_s1, %s640_s18  ;;  %s803_s23 = scalar_lea.vmem (%p49_p3), [#allocation2], %s600_s19 }
   0xf   : > { %v125_v0 = vld [vmem:[%s798_s22] sm:$0xff] (%p49_p3)  ;;  %v127_v1 = vld [vmem:[%s798_s22 + $0x8] sm:$0xff] (%p49_p3)  ;;  %v129_v2 = vld [vmem:[%s798_s22 + $0xd0] sm:$0xff] (%p49_p3) }
  0x10   : > { %126 = vst [vmem:[%s803_s23] sm:$0xff] (%p49_p3), %v125_v0  ;;  %128 = vst [vmem:[%s803_s23 + $0x8] sm:$0xff] (%p49_p3), %v127_v1  ;;  %v131_v3 = vld [vmem:[%s798_s22 + $0xd8] sm:$0xff] (%p49_p3)  ;;  %v133_v4 = vld [vmem:[%s798_s22 + $0x1a0] sm:$0xff] (%p49_p3) }
  0x11   : > { %130 = vst [vmem:[%s803_s23 + $0x10] sm:$0xff] %v129_v2  ;;  %v135_v5 = vld [vmem:[%s798_s22 + $0x1a8] sm:$0xff]  ;;  %132 = vst [vmem:[%s803_s23 + $0x18] sm:$0xff] %v131_v3  ;;  %v137_v6 = vld [vmem:[%s798_s22 + $0x270] sm:$0xff] }
  0x12   : > { %134 = vst [vmem:[%s803_s23 + $0x20] sm:$0xff] %v133_v4  ;;  %136 = vst [vmem:[%s803_s23 + $0x28] sm:$0xff] %v135_v5  ;;  %v139_v7 = vld [vmem:[%s798_s22 + $0x278] sm:$0xff]  ;;  %v141_v8 = vld [vmem:[%s798_s22 + $0x340] sm:$0xff] }
  0x13   : > { %138 = vst [vmem:[%s803_s23 + $0x30] sm:$0xff] %v137_v6  ;;  %140 = vst [vmem:[%s803_s23 + $0x38] sm:$0xff] %v139_v7  ;;  %v143_v9 = vld [vmem:[%s798_s22 + $0x348] sm:$0xff]  ;;  %v145_v10 = vld [vmem:[%s798_s22 + $0x410] sm:$0xff] }
  0x14   : > { %142 = vst [vmem:[%s803_s23 + $0x40] sm:$0xff] %v141_v8  ;;  %v147_v11 = vld [vmem:[%s798_s22 + $0x418] sm:$0xff]  ;;  %144 = vst [vmem:[%s803_s23 + $0x48] sm:$0xff] %v143_v9  ;;  %v149_v12 = vld [vmem:[%s798_s22 + $0x4e0] sm:$0xff] }
  0x15   : > { %146 = vst [vmem:[%s803_s23 + $0x50] sm:$0xff] %v145_v10  ;;  %148 = vst [vmem:[%s803_s23 + $0x58] sm:$0xff] %v147_v11  ;;  %v151_v13 = vld [vmem:[%s798_s22 + $0x4e8] sm:$0xff]  ;;  %v153_v14 = vld [vmem:[%s798_s22 + $0x5b0] sm:$0xff] }
  0x16   : > { %150 = vst [vmem:[%s803_s23 + $0x60] sm:$0xff] %v149_v12  ;;  %152 = vst [vmem:[%s803_s23 + $0x68] sm:$0xff] %v151_v13  ;;  %v155_v15 = vld [vmem:[%s798_s22 + $0x5b8] sm:$0xff]  ;;  %v157_v16 = vld [vmem:[%s798_s22 + $0x680] sm:$0xff] }
  0x17   : > { %154 = vst [vmem:[%s803_s23 + $0x70] sm:$0xff] %v153_v14  ;;  %v159_v17 = vld [vmem:[%s798_s22 + $0x688] sm:$0xff]  ;;  %156 = vst [vmem:[%s803_s23 + $0x78] sm:$0xff] %v155_v15  ;;  %v161_v18 = vld [vmem:[%s798_s22 + $0x750] sm:$0xff] }
  0x18   : > { %158 = vst [vmem:[%s803_s23 + $0x80] sm:$0xff] %v157_v16  ;;  %160 = vst [vmem:[%s803_s23 + $0x88] sm:$0xff] %v159_v17  ;;  %v163_v19 = vld [vmem:[%s798_s22 + $0x758] sm:$0xff]  ;;  %v165_v20 = vld [vmem:[%s798_s22 + $0x820] sm:$0xff] }
  0x19   : > { %162 = vst [vmem:[%s803_s23 + $0x90] sm:$0xff] %v161_v18  ;;  %164 = vst [vmem:[%s803_s23 + $0x98] sm:$0xff] %v163_v19  ;;  %v167_v21 = vld [vmem:[%s798_s22 + $0x828] sm:$0xff]  ;;  %v169_v22 = vld [vmem:[%s798_s22 + $0x8f0] sm:$0xff] }
  0x1a   : > { %166 = vst [vmem:[%s803_s23 + $0xa0] sm:$0xff] %v165_v20  ;;  %v171_v23 = vld [vmem:[%s798_s22 + $0x8f8] sm:$0xff]  ;;  %168 = vst [vmem:[%s803_s23 + $0xa8] sm:$0xff] %v167_v21  ;;  %v173_v24 = vld [vmem:[%s798_s22 + $0x9c0] sm:$0xff] }
  0x1b   : > { %170 = vst [vmem:[%s803_s23 + $0xb0] sm:$0xff] %v169_v22  ;;  %172 = vst [vmem:[%s803_s23 + $0xb8] sm:$0xff] %v171_v23  ;;  %v175_v25 = vld [vmem:[%s798_s22 + $0x9c8] sm:$0xff]  ;;  %v177_v26 = vld [vmem:[%s798_s22 + $0xa90] sm:$0xff] }
  0x1c   : > { %174 = vst [vmem:[%s803_s23 + $0xc0] sm:$0xff] %v173_v24  ;;  %176 = vst [vmem:[%s803_s23 + $0xc8] sm:$0xff] %v175_v25  ;;  %v179_v27 = vld [vmem:[%s798_s22 + $0xa98] sm:$0xff]  ;;  %v181_v28 = vld [vmem:[%s798_s22 + $0xb60] sm:$0xff] }
  0x1d   : > { %178 = vst [vmem:[%s803_s23 + $0xd0] sm:$0xff] %v177_v26  ;;  %v183_v29 = vld [vmem:[%s798_s22 + $0xb68] sm:$0xff]  ;;  %180 = vst [vmem:[%s803_s23 + $0xd8] sm:$0xff] %v179_v27  ;;  %v185_v30 = vld [vmem:[%s798_s22 + $0xc30] sm:$0xff] }
  0x1e   : > { %182 = vst [vmem:[%s803_s23 + $0xe0] sm:$0xff] %v181_v28  ;;  %184 = vst [vmem:[%s803_s23 + $0xe8] sm:$0xff] %v183_v29  ;;  %v187_v31 = vld [vmem:[%s798_s22 + $0xc38] sm:$0xff] }
  0x1f   : > { %186 = vst [vmem:[%s803_s23 + $0xf0] sm:$0xff] %v185_v30  ;;  %188 = vst [vmem:[%s803_s23 + $0xf8] sm:$0xff] %v187_v31 }
  0x20 PF: > { %p603_p5 = scmp.ge.s32.totalorder %s745_s11, 1  ;;  %p193_p6 = scmp.lt.s32.totalorder %s745_s11, 14 }
  0x22   : > { %p194_p7 = pnand %p603_p5, %p193_p6 }
  0x23   : > { %s200_s24 = sand.u32 (!%p194_p7), 1, %s737_s9   ;;  %s605_s29 = sshll.u32 (!%p194_p7), %s596_s12, 2 }
  0x24   : > { %197 = sbr.rel (%p194_p7) target bundleno = 294 (0x126), region = 47  ;;  %s604_s25 = sshll.u32 (!%p194_p7), %s200_s24, 8 }
  0x25   : > { %s869_s26 = scalar_lea.vmem (!%p194_p7), [#allocation2], %s604_s25  ;;  %p222_p8 = scmp.lt.s32.totalorder (!%p194_p7), %s605_s29, 51 }
  0x29   : > { %v747_v32 = vmov 0   ;;  %v667_v33 = vld [vmem:[%s869_s26 + $0xe4] ss:$16 sps:$4 sm:$0xff]   ;;  %v669_v34 = vld [vmem:[%s869_s26 + $0xec] ss:$16 sps:$4 sm:$0xff]   ;;  %v515_v12 = vlaneseq  ;;  %s928_s29 = smov (!%p222_p8, %s605_s29), 51 }
  0x2a   : > { %452 = vmatprep.mubr.bf16.mxu0 %v747_v32  ;;  %493 = vmatprep.mubr.bf16.mxu1 %v747_v32  ;;  %v671_v35 = vld [vmem:[%s869_s26 + $0xe0] ss:$16 sps:$4 sm:$0xff]   ;;  %v672_v36 = vld [vmem:[%s869_s26 + $0xe8] ss:$16 sps:$4 sm:$0xff]   ;;  %v673_v37 = vld [vmem:[%s869_s26 + $0xc4] ss:$16 sps:$4 sm:$0xff]   ;;  %s224_s4 = scalar_lea.vmem %s923_s2, %s928_s29 }
  0x2b   : > { %420 = vmatprep.subr.bf16.mxu0 %v667_v33  ;;  %461 = vmatprep.subr.bf16.mxu1 %v669_v34  ;;  %v675_v38 = vld [vmem:[%s869_s26 + $0xcc] ss:$16 sps:$4 sm:$0xff]   ;;  %v677_v39 = vld [vmem:[%s869_s26 + $0xc0] ss:$16 sps:$4 sm:$0xff]   ;;  %v678_v40 = vld [vmem:[%s869_s26 + $0xc8] ss:$16 sps:$4 sm:$0xff]  }
  0x2c   : > { %421 = vmatpush1.bf16.msra.mxu0 %v671_v35  ;;  %462 = vmatpush1.bf16.msra.mxu1 %v672_v36  ;;  %v679_v41 = vld [vmem:[%s869_s26 + $0xa4] ss:$16 sps:$4 sm:$0xff]   ;;  %v681_v42 = vld [vmem:[%s869_s26 + $0xac] ss:$16 sps:$4 sm:$0xff]   ;;  %v683_v43 = vld [vmem:[%s869_s26 + $0xa0] ss:$16 sps:$4 sm:$0xff]  }
  0x2d   : > { %422 = vmatprep.subr.bf16.mxu0 %v673_v37  ;;  %463 = vmatprep.subr.bf16.mxu1 %v675_v38  ;;  %v684_v44 = vld [vmem:[%s869_s26 + $0xa8] ss:$16 sps:$4 sm:$0xff]   ;;  %v685_v45 = vld [vmem:[%s869_s26 + $0x84] ss:$16 sps:$4 sm:$0xff]   ;;  %v687_v46 = vld [vmem:[%s869_s26 + $0x8c] ss:$16 sps:$4 sm:$0xff]  }
  0x2e   : > { %v689_v47 = vld [vmem:[%s869_s26 + $0x80] ss:$16 sps:$4 sm:$0xff]   ;;  %v690_v48 = vld [vmem:[%s869_s26 + $0x88] ss:$16 sps:$4 sm:$0xff]   ;;  %v691_v49 = vld [vmem:[%s869_s26 + $0x64] ss:$16 sps:$4 sm:$0xff]  }
  0x2f   : > { %v693_v50 = vld [vmem:[%s869_s26 + $0x6c] ss:$16 sps:$4 sm:$0xff]   ;;  %v695_v51 = vld [vmem:[%s869_s26 + $0x60] ss:$16 sps:$4 sm:$0xff]   ;;  %v696_v52 = vld [vmem:[%s869_s26 + $0x68] ss:$16 sps:$4 sm:$0xff]  }
  0x30   : > { %423 = vmatpush1.bf16.msra.mxu0 %v677_v39  ;;  %464 = vmatpush1.bf16.msra.mxu1 %v678_v40  ;;  %v697_v53 = vld [vmem:[%s869_s26 + $0x44] ss:$16 sps:$4 sm:$0xff]   ;;  %v699_v54 = vld [vmem:[%s869_s26 + $0x4c] ss:$16 sps:$4 sm:$0xff]   ;;  %v701_v55 = vld [vmem:[%s869_s26 + $0x40] ss:$16 sps:$4 sm:$0xff]  }
  0x31   : > { %424 = vmatprep.subr.bf16.mxu0 %v679_v41  ;;  %465 = vmatprep.subr.bf16.mxu1 %v681_v42  ;;  %v702_v56 = vld [vmem:[%s869_s26 + $0x48] ss:$16 sps:$4 sm:$0xff]   ;;  %v703_v57 = vld [vmem:[%s869_s26 + $0x24] ss:$16 sps:$4 sm:$0xff]   ;;  %v705_v58 = vld [vmem:[%s869_s26 + $0x2c] ss:$16 sps:$4 sm:$0xff]  }
  0x32   : > { %v707_v59 = vld [vmem:[%s869_s26 + $0x20] ss:$16 sps:$4 sm:$0xff]   ;;  %v708_v60 = vld [vmem:[%s869_s26 + $0x28] ss:$16 sps:$4 sm:$0xff]   ;;  %v709_v61 = vld [vmem:[%s869_s26 + $0x4] ss:$16 sps:$4 sm:$0xff]  }
  0x33   : > { %v711_v62 = vld [vmem:[%s869_s26 + $0xc] ss:$16 sps:$4 sm:$0xff]   ;;  %v713_v63 = vld [vmem:[%s869_s26] ss:$16 sps:$4 sm:$0xff]   ;;  %v714_v0 = vld [vmem:[%s869_s26 + $0x8] ss:$16 sps:$4 sm:$0xff]  }
  0x34   : > { %425 = vmatpush1.bf16.msra.mxu0 %v683_v43  ;;  %466 = vmatpush1.bf16.msra.mxu1 %v684_v44  ;;  %v227_v1 = vld [vmem:[%s921_s0] sm:$0x1]  ;;  %v748_v10 = vmov 1966171168   ;;  %v516_v14 = vshrl.u32 %v515_v12, 7  ;;  %vm537_vm0 = vcmp.lt.s32.totalorder %v515_v12, 512 }
  0x35   : > { %426 = vmatprep.subr.bf16.mxu0 %v685_v45  ;;  %467 = vmatprep.subr.bf16.mxu1 %v687_v46  ;;  %v513_v11 = vunpack.c.l.s4 %v748_v10 }
  0x37   : > { %v514_v13 = vunpack.c.0.s8 %v513_v11 }
  0x38   : > { %427 = vmatpush1.bf16.msra.mxu0 %v689_v47  ;;  %468 = vmatpush1.bf16.msra.mxu1 %v690_v48 }
  0x39   : > { %428 = vmatprep.subr.bf16.mxu0 %v691_v49  ;;  %469 = vmatprep.subr.bf16.mxu1 %v693_v50  ;;  %v517_v17 = vsub.s32 %v514_v13, %v516_v14 }
  0x3c   : > { %429 = vmatpush1.bf16.msra.mxu0 %v695_v51  ;;  %470 = vmatpush1.bf16.msra.mxu1 %v696_v52 }
  0x3d   : > { %430 = vmatprep.subr.bf16.mxu0 %v697_v53  ;;  %471 = vmatprep.subr.bf16.mxu1 %v699_v54 }
  0x40   : > { %431 = vmatpush1.bf16.msra.mxu0 %v701_v55  ;;  %472 = vmatpush1.bf16.msra.mxu1 %v702_v56 }
  0x41   : > { %432 = vmatprep.subr.bf16.mxu0 %v703_v57  ;;  %473 = vmatprep.subr.bf16.mxu1 %v705_v58 }
  0x44   : > { %433 = vmatpush1.bf16.msra.mxu0 %v707_v59  ;;  %474 = vmatpush1.bf16.msra.mxu1 %v708_v60 }
  0x45   : > { %434 = vmatprep.subr.bf16.mxu0 %v709_v61  ;;  %475 = vmatprep.subr.bf16.mxu1 %v711_v62 }
  0x48   : > { %435 = vmatpush1.bf16.msra.mxu0 %v713_v63  ;;  %476 = vmatpush1.bf16.msra.mxu1 %v714_v0 }
  0x4b   : > { %453 = vmatmul.mubr.bf16.vlgmr.msra.gmra.mxu0 %v227_v1  ;;  %494 = vmatmul.mubr.bf16.vlgmr.msra.gmra.mxu1 %v227_v1 }
 0x10b   : > { %v454_v2 = vpop.f32.mrf.mxu0  ;;  %v495_v3 = vpop.f32.mrf.mxu1 }
 0x10c   : > { %715 = vtanh.f32 %v454_v2 }
 0x10d   : > { %717 = vtanh.f32 %v495_v3  ;;  %v456_v4 = vpop.f32.mrf.mxu0  ;;  %v497_v5 = vpop.f32.mrf.mxu1 }
 0x10e   : > { %719 = vtanh.f32 %v456_v4 }
 0x10f   : > { %721 = vtanh.f32 %v497_v5  ;;  %v458_v6 = vpop.f32.mrf.mxu0  ;;  %v499_v7 = vpop.f32.mrf.mxu1 }
 0x111   : > { %v459_v8 = vpop.f32.mrf.mxu0  ;;  %v500_v9 = vpop.f32.mrf.mxu1 }
 0x119   : > { %v716_v15 = vpop.eup %715 }
 0x11a   : > { %v718_v16 = vpop.eup %717 }
 0x11b   : > { %v720_v18 = vpop.eup %719 }
 0x11c   : > { %v722_v19 = vpop.eup %721  ;;  %v510_v20 = vcombine.low %v716_v15, %v720_v18 }
 0x11d   : > { %v511_v21 = vcombine.low %v718_v16, %v722_v19 }
 0x11e   : > { %v518_v22 = vrot.slane %v510_v20, %v517_v17 }
 0x11f   : > { %v525_v23 = vrot.slane %v511_v21, %v517_v17 }
 0x121   : > { %v526_v24 = vcombine.low %v518_v22, %v525_v23 }
 0x123   : > { %v533_v25 = vrot.slane %v526_v24, %v517_v17 }
 0x125   : > { %539 = vst.msk [vmem:[%s224_s4] sm:$0xf] %vm537_vm0, %v533_v25 }
 0x126 PF: > { %p9_p9 = scmp.ge.s32.totalorder %s781_s13, 15   ;;  %s924_s9 = smov %s741_s10 }
 0x127   : > { %s925_s10 = smov %s790_s16  ;;  %s926_s11 = smov %s781_s13 }
 0x128   :  { %11 = sbr.rel (!%p9_p9) target bundleno = 2 (0x2), region = 86 }

</bundles_post_ra>
